<compile_context>
chip_gen: v6e
topology: v6e:2x2x1
jax: 0.10.0
libtpu: 0.0.40
codegen_flags: <defaults>
</compile_context>

<pallas_src>
import jax
import jax.numpy as jnp
from jax.experimental import pallas as pl
from jax.experimental.pallas import tpu as pltpu

KH, KW = 3, 3
LANE = 128


def _round_up(x, m):
    return (x + m - 1) // m * m


def _make_conv_kernel(n_out_rows, wp, n_taps):
    """3x3 'same' conv on a flattened row-block tile as 9 accumulated matmuls."""
    # Tap (di, dj) of output flat-pixel m lives at input flat-pixel m + di*wp + dj.
    offsets = [di * wp + dj for di in range(KH) for dj in range(KW)]

    def kernel(x_ref, w_ref, b_ref, o_ref):
        # x_ref: (1, tile_rows, Cin)        bf16  flattened padded pixels (+halo/slack)
        # w_ref: (n_taps, Cin, COUT_PAD)    bf16  per-tap weights (zero-padded cols)
        # b_ref: (1, COUT_PAD)              f32
        # o_ref: (1, n_out_rows, COUT_PAD)  f32
        x = x_ref[0]                                   # (tile_rows, Cin)
        acc = jnp.zeros(o_ref.shape[1:], jnp.float32)  # (n_out_rows, COUT_PAD)
        for t in range(n_taps):
            off = offsets[t]                           # static python int
            xt = x[off:off + n_out_rows, :]            # (n_out_rows, Cin)
            acc = acc + jnp.dot(xt, w_ref[t],
                                preferred_element_type=jnp.float32)
        acc = acc + b_ref[...]                         # broadcast bias over rows
        o_ref[0] = jnp.maximum(acc, 0.0)               # ReLU, f32 lane-dense store

    return kernel


def _conv3x3_relu_pallas(x_blocks, w_taps, bias, n_out_rows, wp):
    """x_blocks: (NB, tile_rows, Cin) bf16; w_taps: (9, Cin, CP) bf16; bias: (1, CP) f32."""
    nb, tile_rows, cin = x_blocks.shape
    n_taps, _, cout_pad = w_taps.shape
    kernel = _make_conv_kernel(n_out_rows, wp, n_taps)

    flops = 2 * nb * n_out_rows * n_taps * cin * cout_pad
    bytes_accessed = (x_blocks.size * x_blocks.dtype.itemsize
                      + w_taps.size * w_taps.dtype.itemsize
                      + bias.size * 4
                      + nb * n_out_rows * cout_pad * 4)

    return pl.pallas_call(
        kernel,
        out_shape=jax.ShapeDtypeStruct((nb, n_out_rows, cout_pad), jnp.float32),
        grid_spec=pltpu.PrefetchScalarGridSpec(
            num_scalar_prefetch=0,
            grid=(nb,),
            in_specs=[
                pl.BlockSpec((1, tile_rows, cin), lambda i: (i, 0, 0)),
                pl.BlockSpec((n_taps, cin, cout_pad), lambda i: (0, 0, 0)),
                pl.BlockSpec((1, cout_pad), lambda i: (0, 0)),
            ],
            out_specs=pl.BlockSpec((1, n_out_rows, cout_pad), lambda i: (i, 0, 0)),
        ),
        compiler_params=pltpu.CompilerParams(
            dimension_semantics=("parallel",),
            vmem_limit_bytes=32 * 1024 * 1024,
        ),
        cost_estimate=pl.CostEstimate(
            flops=flops, transcendentals=0, bytes_accessed=bytes_accessed),
    )(x_blocks, w_taps, bias)


class FasterRCNNPallas:
    """Synthetic FasterRCNN: forward == feature extractor (conv3x3 + ReLU)."""

    def __init__(self, c_in=4, c_out=32, key=None, block_rows=8):
        if key is None:
            key = jax.random.PRNGKey(42)
        kw_key, kb_key = jax.random.split(key)
        self.c_in, self.c_out = c_in, c_out
        self.block_rows = block_rows
        self.cout_pad = _round_up(max(c_out, LANE), LANE)

        w = jax.random.normal(kw_key, (KH * KW, c_in, c_out), jnp.float32) * 0.05
        b = jax.random.normal(kb_key, (c_out,), jnp.float32) * 0.01
        self.w_f32 = w
        self.b_f32 = b
        # bf16 operands, Cout zero-padded to a full 128-lane width.
        self.w_taps = jnp.pad(
            w, ((0, 0), (0, 0), (0, self.cout_pad - c_out))).astype(jnp.bfloat16)
        self.bias = jnp.pad(b, (0, self.cout_pad - c_out)).reshape(1, self.cout_pad)
        # TODO(synk): the reference forward never invokes rpn/head (and implicitly
        # returns None due to the `self.extracor` typo); we return the extractor
        # feature map instead of faking RPN/ROI heads.

    def __call__(self, img_nchw):
        N, C, H, W = img_nchw.shape
        th = self.block_rows if H % self.block_rows == 0 else H
        n_rb = H // th
        wp = W + 2
        n_out_rows = th * wp
        tile_rows = _round_up((th + 2) * wp + (KW - 1), 8)

        # NCHW -> NHWC, bf16 operands (accumulation stays f32 in-kernel).
        x = jnp.transpose(img_nchw, (0, 2, 3, 1)).astype(jnp.bfloat16)
        xp = jnp.pad(x, ((0, 0), (1, 1), (1, 1), (0, 0)))          # (N, H+2, W+2, C)
        flat = xp.reshape(N, (H + 2) * wp, C)
        slack = tile_rows - (th + 2) * wp                          # >= KW-1
        flat = jnp.pad(flat, ((0, 0), (0, slack), (0, 0)))
        # Overlapping row-block windows (halo of 2 padded rows each) — only a
        # (th+2+slack)/th duplication instead of the 9x im2col expansion.
        starts = jnp.arange(n_rb) * (th * wp)
        idx = starts[:, None] + jnp.arange(tile_rows)[None, :]     # (n_rb, tile_rows)
        blocks = flat[:, idx, :].reshape(N * n_rb, tile_rows, C)

        out = _conv3x3_relu_pallas(blocks, self.w_taps, self.bias,
                                   n_out_rows, wp)                 # (N*n_rb, th*wp, CP)
        out = out.reshape(N, H, wp, self.cout_pad)[:, :, :W, :self.c_out]
        return jnp.transpose(out, (0, 3, 1, 2))                    # (N, Cout, H, W)


if __name__ == "__main__":
    key = jax.random.PRNGKey(0)
    img = jax.random.normal(key, (2, 4, 16, 16), jnp.float32)      # NCHW

    model = FasterRCNNPallas(c_in=4, c_out=32, key=jax.random.PRNGKey(42))
    feature = jax.block_until_ready(model(img))
    assert feature.shape == (2, 32, 16, 16)

    # Pure-JAX reference: same bf16 operand rounding, f32 math.
    x = jnp.transpose(img, (0, 2, 3, 1)).astype(jnp.bfloat16).astype(jnp.float32)
    xp = jnp.pad(x, ((0, 0), (1, 1), (1, 1), (0, 0)))
    w = model.w_taps[:, :, :model.c_out].astype(jnp.float32)
    ref = jnp.zeros((2, 16, 16, model.c_out), jnp.float32)
    for di in range(KH):
        for dj in range(KW):
            ref = ref + jnp.einsum("nhwc,cf->nhwf",
                                   xp[:, di:di + 16, dj:dj + 16, :],
                                   w[di * KW + dj])
    ref = jnp.maximum(ref + model.b_f32, 0.0)
    ref = jnp.transpose(ref, (0, 3, 1, 2))

    err = float(jnp.max(jnp.abs(feature - ref)))
    assert jnp.allclose(feature, ref, atol=2e-3, rtol=2e-3), err

    print("KERNEL_OK")
</pallas_src>

<mosaic_0001>
module attributes {stable_mosaic.version = 11 : i64} {
  func.func @kernel(%arg0: i32, %arg1: memref<1x184x4xbf16, #tpu.memory_space<vmem>>, %arg2: memref<9x4x128xbf16, #tpu.memory_space<vmem>>, %arg3: memref<1x128xf32, #tpu.memory_space<vmem>>, %arg4: memref<1x144x128xf32, #tpu.memory_space<vmem>>) attributes {dimension_semantics = [#tpu.dimension_semantics<parallel>], iteration_bounds = array<i64: 4>, scalar_prefetch = 0 : i64, scratch_operands = 0 : i64, tpu.core_type = #tpu.core_type<tc>, window_params = [{transform_indices = @transform_0, window_bounds = array<i64: 1, 184, 4>}, {pipeline_mode = #tpu.pipeline_mode<synchronous>, transform_indices = @transform_1, window_bounds = array<i64: 9, 4, 128>}, {pipeline_mode = #tpu.pipeline_mode<synchronous>, transform_indices = @transform_2, window_bounds = array<i64: 1, 128>}, {transform_indices = @transform_3, window_bounds = array<i64: 1, 144, 128>}]} {
    %c0 = arith.constant 0 : index
    %c0_0 = arith.constant 0 : index
    %c0_1 = arith.constant 0 : index
    %0 = vector.load %arg1[%c0, %c0_0, %c0_1] : memref<1x184x4xbf16, #tpu.memory_space<vmem>>, vector<1x184x4xbf16>
    %1 = vector.shape_cast %0 : vector<1x184x4xbf16> to vector<184x4xbf16>
    %cst = arith.constant 0.000000e+00 : f32
    %2 = vector.broadcast %cst : f32 to vector<144x128xf32>
    %3 = vector.extract_strided_slice %1 {offsets = [0, 0], sizes = [144, 4], strides = [1, 1]} : vector<184x4xbf16> to vector<144x4xbf16>
    %c0_2 = arith.constant 0 : index
    %c0_3 = arith.constant 0 : index
    %c0_4 = arith.constant 0 : index
    %4 = vector.load %arg2[%c0_2, %c0_3, %c0_4] : memref<9x4x128xbf16, #tpu.memory_space<vmem>>, vector<1x4x128xbf16>
    %5 = vector.shape_cast %4 : vector<1x4x128xbf16> to vector<4x128xbf16>
    %cst_5 = arith.constant dense<0.000000e+00> : vector<144x128xf32>
    %6 = tpu.matmul %3, %5, %cst_5 {dimension_numbers = #tpu.dot_dimension_numbers<[1], [0], [0], [1], [0, 0, 1, 1], [], []>} : vector<144x4xbf16>, vector<4x128xbf16>, vector<144x128xf32> -> vector<144x128xf32>
    %7 = arith.addf %2, %6 : vector<144x128xf32>
    %8 = vector.extract_strided_slice %1 {offsets = [1, 0], sizes = [144, 4], strides = [1, 1]} : vector<184x4xbf16> to vector<144x4xbf16>
    %c1 = arith.constant 1 : index
    %c0_6 = arith.constant 0 : index
    %c0_7 = arith.constant 0 : index
    %9 = vector.load %arg2[%c1, %c0_6, %c0_7] : memref<9x4x128xbf16, #tpu.memory_space<vmem>>, vector<1x4x128xbf16>
    %10 = vector.shape_cast %9 : vector<1x4x128xbf16> to vector<4x128xbf16>
    %cst_8 = arith.constant dense<0.000000e+00> : vector<144x128xf32>
    %11 = tpu.matmul %8, %10, %cst_8 {dimension_numbers = #tpu.dot_dimension_numbers<[1], [0], [0], [1], [0, 0, 1, 1], [], []>} : vector<144x4xbf16>, vector<4x128xbf16>, vector<144x128xf32> -> vector<144x128xf32>
    %12 = arith.addf %7, %11 : vector<144x128xf32>
    %13 = vector.extract_strided_slice %1 {offsets = [2, 0], sizes = [144, 4], strides = [1, 1]} : vector<184x4xbf16> to vector<144x4xbf16>
    %c2 = arith.constant 2 : index
    %c0_9 = arith.constant 0 : index
    %c0_10 = arith.constant 0 : index
    %14 = vector.load %arg2[%c2, %c0_9, %c0_10] : memref<9x4x128xbf16, #tpu.memory_space<vmem>>, vector<1x4x128xbf16>
    %15 = vector.shape_cast %14 : vector<1x4x128xbf16> to vector<4x128xbf16>
    %cst_11 = arith.constant dense<0.000000e+00> : vector<144x128xf32>
    %16 = tpu.matmul %13, %15, %cst_11 {dimension_numbers = #tpu.dot_dimension_numbers<[1], [0], [0], [1], [0, 0, 1, 1], [], []>} : vector<144x4xbf16>, vector<4x128xbf16>, vector<144x128xf32> -> vector<144x128xf32>
    %17 = arith.addf %12, %16 : vector<144x128xf32>
    %18 = vector.extract_strided_slice %1 {offsets = [18, 0], sizes = [144, 4], strides = [1, 1]} : vector<184x4xbf16> to vector<144x4xbf16>
    %c3 = arith.constant 3 : index
    %c0_12 = arith.constant 0 : index
    %c0_13 = arith.constant 0 : index
    %19 = vector.load %arg2[%c3, %c0_12, %c0_13] : memref<9x4x128xbf16, #tpu.memory_space<vmem>>, vector<1x4x128xbf16>
    %20 = vector.shape_cast %19 : vector<1x4x128xbf16> to vector<4x128xbf16>
    %cst_14 = arith.constant dense<0.000000e+00> : vector<144x128xf32>
    %21 = tpu.matmul %18, %20, %cst_14 {dimension_numbers = #tpu.dot_dimension_numbers<[1], [0], [0], [1], [0, 0, 1, 1], [], []>} : vector<144x4xbf16>, vector<4x128xbf16>, vector<144x128xf32> -> vector<144x128xf32>
    %22 = arith.addf %17, %21 : vector<144x128xf32>
    %23 = vector.extract_strided_slice %1 {offsets = [19, 0], sizes = [144, 4], strides = [1, 1]} : vector<184x4xbf16> to vector<144x4xbf16>
    %c4 = arith.constant 4 : index
    %c0_15 = arith.constant 0 : index
    %c0_16 = arith.constant 0 : index
    %24 = vector.load %arg2[%c4, %c0_15, %c0_16] : memref<9x4x128xbf16, #tpu.memory_space<vmem>>, vector<1x4x128xbf16>
    %25 = vector.shape_cast %24 : vector<1x4x128xbf16> to vector<4x128xbf16>
    %cst_17 = arith.constant dense<0.000000e+00> : vector<144x128xf32>
    %26 = tpu.matmul %23, %25, %cst_17 {dimension_numbers = #tpu.dot_dimension_numbers<[1], [0], [0], [1], [0, 0, 1, 1], [], []>} : vector<144x4xbf16>, vector<4x128xbf16>, vector<144x128xf32> -> vector<144x128xf32>
    %27 = arith.addf %22, %26 : vector<144x128xf32>
    %28 = vector.extract_strided_slice %1 {offsets = [20, 0], sizes = [144, 4], strides = [1, 1]} : vector<184x4xbf16> to vector<144x4xbf16>
    %c5 = arith.constant 5 : index
    %c0_18 = arith.constant 0 : index
    %c0_19 = arith.constant 0 : index
    %29 = vector.load %arg2[%c5, %c0_18, %c0_19] : memref<9x4x128xbf16, #tpu.memory_space<vmem>>, vector<1x4x128xbf16>
    %30 = vector.shape_cast %29 : vector<1x4x128xbf16> to vector<4x128xbf16>
    %cst_20 = arith.constant dense<0.000000e+00> : vector<144x128xf32>
    %31 = tpu.matmul %28, %30, %cst_20 {dimension_numbers = #tpu.dot_dimension_numbers<[1], [0], [0], [1], [0, 0, 1, 1], [], []>} : vector<144x4xbf16>, vector<4x128xbf16>, vector<144x128xf32> -> vector<144x128xf32>
    %32 = arith.addf %27, %31 : vector<144x128xf32>
    %33 = vector.extract_strided_slice %1 {offsets = [36, 0], sizes = [144, 4], strides = [1, 1]} : vector<184x4xbf16> to vector<144x4xbf16>
    %c6 = arith.constant 6 : index
    %c0_21 = arith.constant 0 : index
    %c0_22 = arith.constant 0 : index
    %34 = vector.load %arg2[%c6, %c0_21, %c0_22] : memref<9x4x128xbf16, #tpu.memory_space<vmem>>, vector<1x4x128xbf16>
    %35 = vector.shape_cast %34 : vector<1x4x128xbf16> to vector<4x128xbf16>
    %cst_23 = arith.constant dense<0.000000e+00> : vector<144x128xf32>
    %36 = tpu.matmul %33, %35, %cst_23 {dimension_numbers = #tpu.dot_dimension_numbers<[1], [0], [0], [1], [0, 0, 1, 1], [], []>} : vector<144x4xbf16>, vector<4x128xbf16>, vector<144x128xf32> -> vector<144x128xf32>
    %37 = arith.addf %32, %36 : vector<144x128xf32>
    %38 = vector.extract_strided_slice %1 {offsets = [37, 0], sizes = [144, 4], strides = [1, 1]} : vector<184x4xbf16> to vector<144x4xbf16>
    %c7 = arith.constant 7 : index
    %c0_24 = arith.constant 0 : index
    %c0_25 = arith.constant 0 : index
    %39 = vector.load %arg2[%c7, %c0_24, %c0_25] : memref<9x4x128xbf16, #tpu.memory_space<vmem>>, vector<1x4x128xbf16>
    %40 = vector.shape_cast %39 : vector<1x4x128xbf16> to vector<4x128xbf16>
    %cst_26 = arith.constant dense<0.000000e+00> : vector<144x128xf32>
    %41 = tpu.matmul %38, %40, %cst_26 {dimension_numbers = #tpu.dot_dimension_numbers<[1], [0], [0], [1], [0, 0, 1, 1], [], []>} : vector<144x4xbf16>, vector<4x128xbf16>, vector<144x128xf32> -> vector<144x128xf32>
    %42 = arith.addf %37, %41 : vector<144x128xf32>
    %43 = vector.extract_strided_slice %1 {offsets = [38, 0], sizes = [144, 4], strides = [1, 1]} : vector<184x4xbf16> to vector<144x4xbf16>
    %c8 = arith.constant 8 : index
    %c0_27 = arith.constant 0 : index
    %c0_28 = arith.constant 0 : index
    %44 = vector.load %arg2[%c8, %c0_27, %c0_28] : memref<9x4x128xbf16, #tpu.memory_space<vmem>>, vector<1x4x128xbf16>
    %45 = vector.shape_cast %44 : vector<1x4x128xbf16> to vector<4x128xbf16>
    %cst_29 = arith.constant dense<0.000000e+00> : vector<144x128xf32>
    %46 = tpu.matmul %43, %45, %cst_29 {dimension_numbers = #tpu.dot_dimension_numbers<[1], [0], [0], [1], [0, 0, 1, 1], [], []>} : vector<144x4xbf16>, vector<4x128xbf16>, vector<144x128xf32> -> vector<144x128xf32>
    %47 = arith.addf %42, %46 : vector<144x128xf32>
    %c0_30 = arith.constant 0 : index
    %c0_31 = arith.constant 0 : index
    %48 = vector.load %arg3[%c0_30, %c0_31] : memref<1x128xf32, #tpu.memory_space<vmem>>, vector<1x128xf32>
    %49 = vector.broadcast %48 : vector<1x128xf32> to vector<144x128xf32>
    %50 = arith.addf %47, %49 : vector<144x128xf32>
    %cst_32 = arith.constant 0.000000e+00 : f32
    %51 = vector.broadcast %cst_32 : f32 to vector<144x128xf32>
    %52 = arith.maximumf %50, %51 : vector<144x128xf32>
    %c0_33 = arith.constant 0 : index
    %c0_34 = arith.constant 0 : index
    %c0_35 = arith.constant 0 : index
    %53 = vector.load %arg4[%c0_33, %c0_34, %c0_35] : memref<1x144x128xf32, #tpu.memory_space<vmem>>, vector<1x144x128xf32>
    %54 = vector.shape_cast %53 : vector<1x144x128xf32> to vector<144x128xf32>
    %55 = vector.shape_cast %52 : vector<144x128xf32> to vector<1x144x128xf32>
    tpu.vector_store %arg4[%c0_33, %c0_34, %c0_35], %55 {strides = array<i32>} : memref<1x144x128xf32, #tpu.memory_space<vmem>>, vector<1x144x128xf32>,
    return
  }
  func.func @transform_0(%arg0: i32) -> (i32, i32, i32) {
    %c0_i32 = arith.constant 0 : i32
    %c0_i32_0 = arith.constant 0 : i32
    %c0_i32_1 = arith.constant 0 : i32
    return %arg0, %c0_i32, %c0_i32_0 : i32, i32, i32
  }
  func.func @transform_1(%arg0: i32) -> (i32, i32, i32) {
    %c0_i32 = arith.constant 0 : i32
    %c0_i32_0 = arith.constant 0 : i32
    %c0_i32_1 = arith.constant 0 : i32
    %c0_i32_2 = arith.constant 0 : i32
    return %c0_i32, %c0_i32_0, %c0_i32_1 : i32, i32, i32
  }
  func.func @transform_2(%arg0: i32) -> (i32, i32) {
    %c0_i32 = arith.constant 0 : i32
    %c0_i32_0 = arith.constant 0 : i32
    %c0_i32_1 = arith.constant 0 : i32
    return %c0_i32, %c0_i32_0 : i32, i32
  }
  func.func @transform_3(%arg0: i32) -> (i32, i32, i32) {
    %c0_i32 = arith.constant 0 : i32
    %c0_i32_0 = arith.constant 0 : i32
    %c0_i32_1 = arith.constant 0 : i32
    return %arg0, %c0_i32, %c0_i32_0 : i32, i32, i32
  }
}

</mosaic_0001>

<bundles_post_ra>
// kernel: tpu_custom_call.1
= control target key start
LH: loop header
LB: loop body
LE: loop exit
PB: predicated region body
PF: predicated region fallthrough
CT: control target
= control target key end

     0   :  { %8 = vsyncpa [#allocation3], 0  ;;  %s3593_s0 = inlined_call_operand.vmem [shape: bf16[4,184,4], index: 0, kind: input, shape index: {}]   ;;  %s3594_s1 = inlined_call_operand.vmem [shape: bf16[9,4,128], index: 1, kind: input, shape index: {}]   ;;  %s3595_s2 = inlined_call_operand.vmem [shape: f32[1,128], index: 2, kind: input, shape index: {}]   ;;  %s3596_s3 = inlined_call_operand.hbm [shape: f32[4,144,128], index: 3, kind: output, shape index: {}]  }
   0x1   :  { %10 = vsyncpa [#allocation3 + $0x1], 0  ;;  %s2637_s12 = smov 0   ;;  %s2639_s13 = smov 0  }
   0x2   :  { %s2641_s14 = smov 0   ;;  %s2643_s15 = smov 0  }
   0x3 LB: > { %s2658_s16 = sadd.s32 4294967295, %s2610_s15   ;;  %s1944_s17 = sadd.s32 4294967294, %s2610_s15   ;;  %s2610_s15 = sphi %s2643_s15, %s3602_s15   ;;  %s2606_s14 = sphi %s2641_s14, %s3601_s14   ;;  %s2602_s13 = sphi %s2639_s13, %s3600_s13   ;;  %s2598_s12 = sphi %s2637_s12, %s3599_s12  }
   0x4   : > { %s2662_s18 = sadd.s32 1, %s2610_s15   ;;  %s91_s19 = sadd.s32 1, %s2606_s14 }
   0x5   : > { %s88_s20 = ssub.s32 %s2610_s15, %s2662_s18  ;;  %p101_p0 = scmp.ne.s32.totalorder %s2606_s14, %s2602_s13 }
   0x6   : > { %p89_p1 = scmp.eq.s32.totalorder %s88_s20, 0  ;;  %p102_p2 = scmp.eq.s32.totalorder %s2658_s16, 3 }
   0x7   : > { %p107_p3 = scmp.ne.s32.totalorder %s2602_s13, %s2598_s12  ;;  %p108_p4 = scmp.eq.s32.totalorder %s1944_s17, 3 }
   0x8   : > { %s2673_s21 = scalar_select %p89_p1, %s2606_s14, %s91_s19  }
   0x9   : > { %p2675_p5 = por %p102_p2, %p101_p0  ;;  %p2679_p6 = por %p108_p4, %p107_p3 }
   0xa   : > { %p1947_p7 = scmp.ge.s32.totalorder %s2610_s15, 1  ;;  %p140_p8 = scmp.lt.s32.totalorder %s2610_s15, 5 }
   0xc   : > { %p141_p9 = pnand %p1947_p7, %p140_p8 }
   0xd   : > { %p164_p10 = scmp.lt.s32.totalorder (!%p141_p9), %s2658_s16, 3  ;;  %s161_s29 = sand.u32 (!%p141_p9), 1, %s2602_s13  }
   0xe   : > { %144 = sbr.rel (%p141_p9) target bundleno = 569 (0x239), region = 32  ;;  %s3553_s17 = scalar_lea.sflag (!%p141_p9), [#allocation3], %s161_s29 }
   0xf   : > { %s2492_s7 = smul.u32 (!%p141_p9), 2304, %s2658_s16  ;;  %s2614_s19 = smov (!%p141_p9), [#allocation2]  }
  0x10   : > { %s2554_s20 = sshll.u32 (!%p141_p9), %s2614_s19, 4  ;;  %s2555_s20 = int_to_ptr.vmem [resolvable:$false] %s2554_s20 }
  0x11   : > { %s3548_s11 = scalar_lea.hbm (!%p141_p9), %s3596_s3, %s2492_s7  ;;  %s2556_s24 = scalar_lea.vmem (!%p141_p9), %s2555_s20, 4608 }
  0x13   : > { %v1949_v0 = vld [vmem:[%s3594_s1 + $0x2] sm:$0x3]  ;;  %vm349_vm0 = vcmask 1041408   ;;  %v2612_v1 = vmov 0.0   ;;  %s165_s26 = scalar_select %p164_p10, %s2658_s16, 3  ;;  %vm2613_vm1 = vmmov 0  }
  0x14   : > { %2146 = vmatprep.subr.bf16.mxu0 %v2612_v1  ;;  %2488 = vmatprep.subr.bf16.mxu1 %v2612_v1  ;;  %v351_v2 = vsel %vm349_vm0, %v1949_v0, 0  ;;  %vm244_vm2 = vsmask.f32 7424  ;;  %v1978_v9 = vld [vmem:[%s3594_s1 + $0x4] sm:$0x3]  ;;  %vm321_vm3 = vcmask 31744  }
  0x15   : > { %2147 = vmatpush3.bf16.msra.mxu0 %v351_v2  ;;  %2489 = vmatpush3.bf16.msra.mxu1 %v351_v2  ;;  %s2491_s27 = smul.u32 92, %s165_s26  ;;  %v193_v16 = vld [vmem:[%s3594_s1] sm:$0x3]  ;;  %v634_v26 = vsel %vm349_vm0, %v1978_v9, 0  ;;  %vm586_vm4 = vcmask 1046528   ;;  %vm1110_vm7 = vcmask 1045504  }
  0x16   : > { %2148 = vmatprep.mubr.msk.bf16.mxu0 %vm2613_vm1, %v2612_v1  ;;  %2168 = vmatprep.mubr.msk.bf16.mxu1 %vm2613_vm1, %v2612_v1  ;;  %v477_v32 = vsel %vm349_vm0, %v193_v16, 0  ;;  %vm905_vm5 = vsmask.f32 6400  ;;  %vm1429_vm6 = vsmask.f32 5376  ;;  %vm1634_vm8 = vcmask 1044480  }
  0x17   : > { %2222 = vmatprep.subr.bf16.mxu0 %v2612_v1  ;;  %2184 = vmatprep.subr.bf16.mxu1 %v2612_v1  ;;  %s2702_s30 = scalar_lea.vmem %s3593_s0, %s2491_s27 }
  0x18   : > { %v2705_v3 = vld [vmem:[%s2702_s30] sm:$0xff]   ;;  %v2708_v4 = vld [vmem:[%s2702_s30 + $0x8] sm:$0xff]   ;;  %v2720_v10 = vld [vmem:[%s2702_s30 + $0x30] sm:$0xff]  }
  0x19   : > { %v246_v5 = vshrl.u32 %v2705_v3, 16  ;;  %v248_v6 = vshll.u32 %v2705_v3, 16  ;;  %v253_v7 = vshll.u32 %v2708_v4, 16  ;;  %v2714_v8 = vld [vmem:[%s2702_s30 + $0x28] sm:$0xff]   ;;  %v257_v11 = vshrl.u32 %v2708_v4, 16  ;;  %v2732_v17 = vld [vmem:[%s2702_s30 + $0x10] sm:$0xff]  }
  0x1a   : > { %v2726_v15 = vshll.u32 %v2714_v8, 16  ;;  %v2735_v18 = vld [vmem:[%s2702_s30 + $0x38] sm:$0xff]   ;;  %v2738_v19 = vshrl.u32 %v2714_v8, 16  ;;  %v2741_v20 = vshll.u32 %v2720_v10, 16  ;;  %v2747_v24 = vshll.u32 %v2732_v17, 16  ;;  %v2779_v39 = vld [vmem:[%s2702_s30 + $0x40] sm:$0xff]  }
  0x1b   : > { %v250_v12 = vrot.slane %v248_v6, 1  ;;  %v255_v13 = vrot.slane %v253_v7, 1  ;;  %v2723_v14 = vrot.slane %v253_v7, 2  ;;  %v2743_v21 = vrot.slane %v257_v11, 1  ;;  %v2770_v36 = vld [vmem:[%s2702_s30 + $0x18] sm:$0xff]   ;;  %v2803_v49 = vld [vmem:[%s2702_s30 + $0x20] sm:$0xff]  }
  0x1c   : > { %v287_v23 = vrot.slane %v2726_v15, 1  ;;  %v295_v25 = vrot.slane %v2741_v20, 1  ;;  %v2758_v30 = vshrl.u32 %v2720_v10, 16  ;;  %v2761_v31 = vshll.u32 %v2735_v18, 16  ;;  %v188_v43 = vld [vmem:[%s2702_s30 + $0x48] sm:$0xf] }
  0x1d   : > { %v251_v22 = vor.u32 %v250_v12, %v246_v5  ;;  %v908_v27 = vor.u32 %v2723_v14, %v2743_v21  ;;  %v259_v34 = vor.u32 %v257_v11, %v255_v13  ;;  %v263_v35 = vrot.slane %v2747_v24, 1  ;;  %v189_v16 = vld [vmem:[%s2702_s30 + $0x4c] sm:$0xf] }
  0x1e   : > { %v291_v29 = vor.u32 %v2738_v19, %v287_v23  ;;  %v299_v37 = vor.u32 %v2758_v30, %v295_v25  ;;  %v303_v38 = vrot.slane %v2761_v31, 1  ;;  %v2784_v41 = vshrl.u32 %v2732_v17, 16 }
  0x1f   : > { %v256_v28 = vsel %vm244_vm2, %v251_v22, %v255_v13  ;;  %v264_v40 = vsel %vm244_vm2, %v259_v34, %v263_v35  ;;  %v2787_v42 = vshll.u32 %v2770_v36, 16  ;;  %v2792_v45 = vshrl.u32 %v2735_v18, 16 }
  0x20   : > { %2149 = vmatmul.mubr.msk.bf16.vlgmr.msra.gmra.mxu0 %vm321_vm3, %v256_v28  ;;  %v296_v33 = vsel %vm244_vm2, %v291_v29, %v295_v25  ;;  %v304_v44 = vsel %vm244_vm2, %v299_v37, %v303_v38  ;;  %v2795_v46 = vshll.u32 %v2779_v39, 16  ;;  %v267_v47 = vor.u32 %v2784_v41, %v263_v35  ;;  %v2000_v37 = vld [vmem:[%s3594_s1 + $0x8] sm:$0x3] }
  0x21   : > { %2223 = vmatpush3.bf16.msra.mxu0 %v634_v26  ;;  %2152 = vmatprep.mubr.msk.bf16.mxu0 %vm2613_vm1, %v2612_v1  ;;  %v271_v48 = vrot.slane %v2787_v42, 1  ;;  %v1959_v50 = vcombine.low %v188_v43, %v188_v43  ;;  %v2807_v51 = vshrl.u32 %v2770_v36, 16  ;;  %v307_v52 = vor.u32 %v2792_v45, %v303_v38 }
  0x22   : > { %2169 = vmatmul.mubr.msk.bf16.vlgmr.msra.gmra.mxu1 %vm321_vm3, %v296_v33  ;;  %2298 = vmatprep.subr.bf16.mxu0 %v2612_v1  ;;  %v311_v53 = vrot.slane %v2795_v46, 1  ;;  %v2814_v54 = vrot.slane %v2779_v39, 1  ;;  %v909_v56 = vrot.slane %v2784_v41, 1  ;;  %v910_v57 = vrot.slane %v2747_v24, 2 }
  0x23   : > { %2185 = vmatpush3.bf16.msra.mxu1 %v477_v32  ;;  %2172 = vmatprep.mubr.msk.bf16.mxu1 %vm2613_vm1, %v2612_v1  ;;  %v604_v55 = vrot.slane %v1959_v50, 1  ;;  %v913_v58 = vrot.slane %v2807_v51, 1  ;;  %v914_v59 = vrot.slane %v2787_v42, 2  ;;  %v272_v60 = vsel %vm244_vm2, %v267_v47, %v271_v48  ;;  %v1988_v32 = vld [vmem:[%s3594_s1 + $0x6] sm:$0x3] }
  0x24   : > { %2260 = vmatprep.subr.bf16.mxu1 %v2612_v1  ;;  %v2822_v61 = vshll.u32 %v2803_v49, 16  ;;  %v911_v63 = vor.u32 %v910_v57, %v909_v56  ;;  %v312_v2 = vsel %vm244_vm2, %v307_v52, %v311_v53  ;;  %v2832_v5 = vshrl.u32 %v2779_v39, 16 }
  0x25   : > { %v2826_v62 = vsel %vm586_vm4, %v2814_v54, %v604_v55  ;;  %v2828_v0 = vor.u32 %v914_v59, %v913_v58  ;;  %v317_v6 = vshll.u32 %v1959_v50, 16  ;;  %v275_v11 = vor.u32 %v2807_v51, %v271_v48 }
  0x26   : > { %v2836_v7 = vsel %vm905_vm5, %v908_v27, %v911_v63  ;;  %v279_v12 = vrot.slane %v2822_v61, 1  ;;  %v315_v13 = vor.u32 %v2832_v5, %v311_v53  ;;  %v2853_v22 = vshrl.u32 %v2803_v49, 16 }
  0x27   : > { %v2840_v9 = vsel %vm905_vm5, %v911_v63, %v2828_v0  ;;  %v319_v14 = vrot.slane %v317_v6, 1  ;;  %v2856_v26 = vcombine.low %v188_v43, %v189_v16  ;;  %v778_v34 = vsel %vm349_vm0, %v1988_v32, 0  ;;  %v2020_v63 = vld [vmem:[%s3594_s1 + $0xc] sm:$0x3] }
  0x28   : > { %2153 = vmatmul.mubr.msk.bf16.gmra.mxu0 %vm321_vm3, %v264_v40  ;;  %v280_v21 = vsel %vm244_vm2, %v275_v11, %v279_v12  ;;  %v283_v27 = vor.u32 %v2853_v22, %v279_v12  ;;  %v587_v35 = vrot.slane %v2705_v3, 1  ;;  %v983_v40 = vsel %vm349_vm0, %v2000_v37, 0 }
  0x29   : > { %2156 = vmatprep.mubr.msk.bf16.mxu0 %vm2613_vm1, %v2612_v1  ;;  %v320_v25 = vsel %vm244_vm2, %v315_v13, %v319_v14  ;;  %v767_v28 = vrot.slane %v2856_v26, 1  ;;  %v594_v48 = vrot.slane %v2803_v49, 1  ;;  %v596_v52 = vrot.slane %v2714_v8, 1 }
  0x2a   : > { %2173 = vmatmul.mubr.msk.bf16.gmra.mxu1 %vm321_vm3, %v304_v44  ;;  %v288_v29 = vsel %vm244_vm2, %v283_v27, %v287_v23  ;;  %v588_v23 = vrot.slane %v2708_v4, 1  ;;  %v592_v44 = vrot.slane %v2770_v36, 1  ;;  %v598_v55 = vrot.slane %v2720_v10, 1 }
  0x2b   : > { %2176 = vmatprep.mubr.msk.bf16.mxu1 %vm2613_vm1, %v2612_v1  ;;  %v2876_v33 = vsel %vm586_vm4, %v2814_v54, %v767_v28  ;;  %v597_v53 = vsel %vm586_vm4, %v594_v48, %v596_v52  ;;  %v600_v57 = vrot.slane %v2735_v18, 1  ;;  %v1430_v6 = vrot.slane %v2784_v41, 2 }
  0x2c   : > { %v589_v38 = vsel %vm586_vm4, %v587_v35, %v588_v23  ;;  %v595_v50 = vsel %vm586_vm4, %v592_v44, %v594_v48  ;;  %v599_v56 = vsel %vm586_vm4, %v596_v52, %v598_v55  ;;  %v1434_v11 = vrot.slane %v2787_v42, 3 }
  0x2d   : > { %v2949_v58 = vsel %vm586_vm4, %v598_v55, %v600_v57  ;;  %v2961_v59 = vsel %vm586_vm4, %v600_v57, %v2814_v54  ;;  %v1433_v12 = vrot.slane %v2807_v51, 2  ;;  %v918_v13 = vrot.slane %v2822_v61, 2 }
  0x2e   : > { %v921_v51 = vrot.slane %v2738_v19, 1  ;;  %v925_v27 = vrot.slane %v2758_v30, 1  ;;  %v930_v35 = vrot.slane %v2761_v31, 2 }
  0x2f   : > { %v3001_v16 = vor.u32 %v1434_v11, %v1433_v12 }
  0x30   : > { %2157 = vmatmul.mubr.msk.bf16.gmra.mxu0 %vm321_vm3, %v272_v60  ;;  %v2010_v60 = vld [vmem:[%s3594_s1 + $0xa] sm:$0x3] }
  0x31   : > { %2160 = vmatprep.mubr.msk.bf16.mxu0 %vm2613_vm1, %v2612_v1  ;;  %v1158_v54 = vsel %vm349_vm0, %v2010_v60, 0 }
  0x32   : > { %2177 = vmatmul.mubr.msk.bf16.gmra.mxu1 %vm321_vm3, %v312_v2  ;;  %v1302_v2 = vsel %vm349_vm0, %v2020_v63, 0 }
  0x33   : > { %2180 = vmatprep.mubr.msk.bf16.mxu1 %vm2613_vm1, %v2612_v1 }
  0x38   : > { %2161 = vmatmul.mubr.msk.bf16.gmra.mxu0 %vm321_vm3, %v280_v21 }
  0x39   : > { %2164 = vmatprep.mubr.msk.bf16.mxu0 %vm2613_vm1, %v2612_v1 }
  0x3a   : > { %2181 = vmatmul.mubr.msk.bf16.gmra.mxu1 %vm321_vm3, %v320_v25 }
  0x3b   : > { %2186 = vmatprep.mubr.msk.bf16.mxu1 %vm2613_vm1, %v2612_v1 }
  0x40   : > { %2165 = vmatmul.mubr.msk.bf16.gmra.mxu0 %vm321_vm3, %v288_v29 }
  0x41   : > { %2224 = vmatprep.mubr.msk.bf16.mxu0 %vm2613_vm1, %v2612_v1 }
  0x42   : > { %2187 = vmatmul.mubr.msk.bf16.vlgmr.msra.gmra.mxu1 %vm321_vm3, %v2705_v3  ;;  %v590_v3 = vrot.slane %v2732_v17, 1 }
  0x43   : > { %2261 = vmatpush3.bf16.msra.mxu1 %v778_v34  ;;  %2190 = vmatprep.mubr.msk.bf16.mxu1 %vm2613_vm1, %v2612_v1  ;;  %v929_v34 = vrot.slane %v2792_v45, 1 }
  0x44   : > { %2336 = vmatprep.subr.bf16.mxu1 %v2612_v1  ;;  %v591_v43 = vsel %vm586_vm4, %v588_v23, %v590_v3  ;;  %v593_v47 = vsel %vm586_vm4, %v590_v3, %v592_v44  ;;  %v941_v44 = vshll.u32 %v2856_v26, 16 }
  0x45   : > { %v931_v23 = vor.u32 %v930_v35, %v929_v34 }
  0x46   : > { %v943_v52 = vrot.slane %v941_v44, 2 }
  0x48   : > { %2225 = vmatmul.mubr.msk.bf16.vlgmr.msra.gmra.mxu0 %vm321_vm3, %v589_v38  ;;  %v933_v38 = vrot.slane %v2832_v5, 1 }
  0x49   : > { %2299 = vmatpush3.bf16.msra.mxu0 %v983_v40  ;;  %2228 = vmatprep.mubr.msk.bf16.mxu0 %vm2613_vm1, %v2612_v1  ;;  %v934_v40 = vrot.slane %v2795_v46, 2 }
  0x4a   : > { %2191 = vmatmul.mubr.msk.bf16.gmra.mxu1 %vm321_vm3, %v2708_v4  ;;  %2374 = vmatprep.subr.bf16.mxu0 %v2612_v1 }
  0x4b   : > { %2194 = vmatprep.mubr.msk.bf16.mxu1 %vm2613_vm1, %v2612_v1  ;;  %v935_v3 = vor.u32 %v934_v40, %v933_v38 }
  0x4d   : > { %v936_v48 = vsel %vm905_vm5, %v931_v23, %v935_v3 }
  0x50   : > { %2229 = vmatmul.mubr.msk.bf16.gmra.mxu0 %vm321_vm3, %v591_v43 }
  0x51   : > { %2232 = vmatprep.mubr.msk.bf16.mxu0 %vm2613_vm1, %v2612_v1 }
  0x52   : > { %2195 = vmatmul.mubr.msk.bf16.gmra.mxu1 %vm321_vm3, %v2732_v17 }
  0x53   : > { %2198 = vmatprep.mubr.msk.bf16.mxu1 %vm2613_vm1, %v2612_v1 }
  0x58   : > { %2233 = vmatmul.mubr.msk.bf16.gmra.mxu0 %vm321_vm3, %v593_v47 }
  0x59   : > { %2236 = vmatprep.mubr.msk.bf16.mxu0 %vm2613_vm1, %v2612_v1 }
  0x5a   : > { %2199 = vmatmul.mubr.msk.bf16.gmra.mxu1 %vm321_vm3, %v2770_v36 }
  0x5b   : > { %2202 = vmatprep.mubr.msk.bf16.mxu1 %vm2613_vm1, %v2612_v1 }
  0x60   : > { %2237 = vmatmul.mubr.msk.bf16.gmra.mxu0 %vm321_vm3, %v595_v50 }
  0x61   : > { %2240 = vmatprep.mubr.msk.bf16.mxu0 %vm2613_vm1, %v2612_v1 }
  0x62   : > { %2203 = vmatmul.mubr.msk.bf16.gmra.mxu1 %vm321_vm3, %v2803_v49 }
  0x63   : > { %2206 = vmatprep.mubr.msk.bf16.mxu1 %vm2613_vm1, %v2612_v1 }
  0x68   : > { %2241 = vmatmul.mubr.msk.bf16.gmra.mxu0 %vm321_vm3, %v597_v53 }
  0x69   : > { %2244 = vmatprep.mubr.msk.bf16.mxu0 %vm2613_vm1, %v2612_v1 }
  0x6a   : > { %2207 = vmatmul.mubr.msk.bf16.gmra.mxu1 %vm321_vm3, %v2714_v8 }
  0x6b   : > { %2210 = vmatprep.mubr.msk.bf16.mxu1 %vm2613_vm1, %v2612_v1 }
  0x70   : > { %2245 = vmatmul.mubr.msk.bf16.gmra.mxu0 %vm321_vm3, %v599_v56 }
  0x71   : > { %2248 = vmatprep.mubr.msk.bf16.mxu0 %vm2613_vm1, %v2612_v1 }
  0x72   : > { %2211 = vmatmul.mubr.msk.bf16.gmra.mxu1 %vm321_vm3, %v2720_v10 }
  0x73   : > { %2214 = vmatprep.mubr.msk.bf16.mxu1 %vm2613_vm1, %v2612_v1 }
  0x78   : > { %2249 = vmatmul.mubr.msk.bf16.gmra.mxu0 %vm321_vm3, %v2949_v58 }
  0x79   : > { %2252 = vmatprep.mubr.msk.bf16.mxu0 %vm2613_vm1, %v2612_v1 }
  0x7a   : > { %2215 = vmatmul.mubr.msk.bf16.gmra.mxu1 %vm321_vm3, %v2735_v18 }
  0x7b   : > { %2218 = vmatprep.mubr.msk.bf16.mxu1 %vm2613_vm1, %v2612_v1 }
  0x80   : > { %2253 = vmatmul.mubr.msk.bf16.gmra.mxu0 %vm321_vm3, %v2961_v59 }
  0x81   : > { %2256 = vmatprep.mubr.msk.bf16.mxu0 %vm2613_vm1, %v2612_v1 }
  0x82   : > { %2219 = vmatmul.mubr.msk.bf16.gmra.mxu1 %vm321_vm3, %v2779_v39 }
  0x83   : > { %2262 = vmatprep.mubr.msk.bf16.mxu1 %vm2613_vm1, %v2612_v1 }
  0x88   : > { %2257 = vmatmul.mubr.msk.bf16.gmra.mxu0 %vm321_vm3, %v2826_v62  ;;  %v1431_v62 = vrot.slane %v2747_v24, 3 }
  0x89   : > { %2300 = vmatprep.mubr.msk.bf16.mxu0 %vm2613_vm1, %v2612_v1 }
  0x8a   : > { %2263 = vmatmul.mubr.msk.bf16.vlgmr.msra.gmra.mxu1 %vm321_vm3, %v591_v43  ;;  %v1432_v14 = vor.u32 %v1431_v62, %v1430_v6  ;;  %v938_v43 = vshrl.u32 %v2856_v26, 16  ;;  %v1112_v62 = vrot.slane %v2732_v17, 2 }
  0x8b   : > { %2337 = vmatpush3.bf16.msra.mxu1 %v1158_v54  ;;  %2266 = vmatprep.mubr.msk.bf16.mxu1 %vm2613_vm1, %v2612_v1 }
  0x8c   : > { %2412 = vmatprep.subr.bf16.mxu1 %v2612_v1  ;;  %v3009_v41 = vsel %vm1429_vm6, %v1432_v14, %v3001_v16 }
  0x90   : > { %2301 = vmatmul.mubr.msk.bf16.vlgmr.msra.gmra.mxu0 %vm321_vm3, %v2836_v7  ;;  %v917_v7 = vrot.slane %v2853_v22, 1 }
  0x91   : > { %2375 = vmatpush3.bf16.msra.mxu0 %v1302_v2  ;;  %2304 = vmatprep.mubr.msk.bf16.mxu0 %vm2613_vm1, %v2612_v1 }
  0x92   : > { %2267 = vmatmul.mubr.msk.bf16.gmra.mxu1 %vm321_vm3, %v593_v47  ;;  %2450 = vmatprep.subr.bf16.mxu0 %v2612_v1  ;;  %v919_v24 = vor.u32 %v918_v13, %v917_v7  ;;  %v3056_v47 = vld [vmem:[%s2702_s30 + $0x50] sm:$0xf] }
  0x93   : > { %2270 = vmatprep.mubr.msk.bf16.mxu1 %vm2613_vm1, %v2612_v1  ;;  %v2042_v7 = vld [vmem:[%s3594_s1 + $0x10] sm:$0x3] }
  0x94   : > { %v920_v42 = vsel %vm905_vm5, %v2828_v0, %v919_v24  ;;  %v926_v0 = vrot.slane %v2741_v20, 2  ;;  %v1682_v14 = vsel %vm349_vm0, %v2042_v7, 0 }
  0x96   : > { %v927_v29 = vor.u32 %v926_v0, %v925_v27 }
  0x98   : > { %2305 = vmatmul.mubr.msk.bf16.gmra.mxu0 %vm321_vm3, %v2840_v9  ;;  %v922_v9 = vrot.slane %v2726_v15, 2  ;;  %v932_v37 = vsel %vm905_vm5, %v927_v29, %v931_v23 }
  0x99   : > { %2308 = vmatprep.mubr.msk.bf16.mxu0 %vm2613_vm1, %v2612_v1 }
  0x9a   : > { %2271 = vmatmul.mubr.msk.bf16.gmra.mxu1 %vm321_vm3, %v595_v50  ;;  %v923_v21 = vor.u32 %v922_v9, %v921_v51  ;;  %v940_v50 = vrot.slane %v938_v43, 1  ;;  %v1118_v9 = vrot.slane %v2714_v8, 2 }
  0x9b   : > { %2274 = vmatprep.mubr.msk.bf16.mxu1 %vm2613_vm1, %v2612_v1 }
  0x9c   : > { %v924_v25 = vsel %vm905_vm5, %v919_v24, %v923_v21  ;;  %v928_v32 = vsel %vm905_vm5, %v923_v21, %v927_v29  ;;  %v944_v55 = vor.u32 %v943_v52, %v940_v50  ;;  %v1116_v24 = vrot.slane %v2803_v49, 2 }
  0x9e   : > { %v1119_v29 = vsel %vm1110_vm7, %v1116_v24, %v1118_v9 }
  0xa0   : > { %2309 = vmatmul.mubr.msk.bf16.gmra.mxu0 %vm321_vm3, %v920_v42 }
  0xa1   : > { %2312 = vmatprep.mubr.msk.bf16.mxu0 %vm2613_vm1, %v2612_v1 }
  0xa2   : > { %2275 = vmatmul.mubr.msk.bf16.gmra.mxu1 %vm321_vm3, %v597_v53  ;;  %v3065_v53 = vcombine.low %v3056_v47, %v3056_v47 }
  0xa3   : > { %2278 = vmatprep.mubr.msk.bf16.mxu1 %vm2613_vm1, %v2612_v1 }
  0xa4   : > { %v950_v57 = vshll.u32 %v3065_v53, 16 }
  0xa6   : > { %v952_v54 = vrot.slane %v950_v57, 2 }
  0xa8   : > { %2313 = vmatmul.mubr.msk.bf16.gmra.mxu0 %vm321_vm3, %v924_v25 }
  0xa9   : > { %2316 = vmatprep.mubr.msk.bf16.mxu0 %vm2613_vm1, %v2612_v1 }
  0xaa   : > { %2279 = vmatmul.mubr.msk.bf16.gmra.mxu1 %vm321_vm3, %v599_v56  ;;  %v947_v56 = vshrl.u32 %v3065_v53, 16 }
  0xab   : > { %2282 = vmatprep.mubr.msk.bf16.mxu1 %vm2613_vm1, %v2612_v1 }
  0xac   : > { %v949_v60 = vrot.slane %v947_v56, 1 }
  0xae   : > { %v953_v2 = vor.u32 %v952_v54, %v949_v60 }
  0xb0   : > { %2317 = vmatmul.mubr.msk.bf16.gmra.mxu0 %vm321_vm3, %v928_v32  ;;  %v954_v6 = vsel %vm905_vm5, %v944_v55, %v953_v2 }
  0xb1   : > { %2320 = vmatprep.mubr.msk.bf16.mxu0 %vm2613_vm1, %v2612_v1 }
  0xb2   : > { %2283 = vmatmul.mubr.msk.bf16.gmra.mxu1 %vm321_vm3, %v2949_v58  ;;  %v769_v58 = vrot.slane %v3065_v53, 1 }
  0xb3   : > { %2286 = vmatprep.mubr.msk.bf16.mxu1 %vm2613_vm1, %v2612_v1 }
  0xb4   : > { %v770_v63 = vsel %vm586_vm4, %v767_v28, %v769_v58  ;;  %v2032_v28 = vld [vmem:[%s3594_s1 + $0xe] sm:$0x3]  ;;  %v1122_v58 = vrot.slane %v2735_v18, 2 }
  0xb5   : > { %v1507_v12 = vsel %vm349_vm0, %v2032_v28, 0 }
  0xb8   : > { %2321 = vmatmul.mubr.msk.bf16.gmra.mxu0 %vm321_vm3, %v932_v37  ;;  %v1120_v37 = vrot.slane %v2720_v10, 2 }
  0xb9   : > { %2324 = vmatprep.mubr.msk.bf16.mxu0 %vm2613_vm1, %v2612_v1 }
  0xba   : > { %2287 = vmatmul.mubr.msk.bf16.gmra.mxu1 %vm321_vm3, %v2961_v59  ;;  %v945_v59 = vsel %vm905_vm5, %v935_v3, %v944_v55  ;;  %v1121_v50 = vsel %vm1110_vm7, %v1118_v9, %v1120_v37  ;;  %v1123_v2 = vsel %vm1110_vm7, %v1120_v37, %v1122_v58 }
  0xbb   : > { %2290 = vmatprep.mubr.msk.bf16.mxu1 %vm2613_vm1, %v2612_v1 }
  0xc0   : > { %2325 = vmatmul.mubr.msk.bf16.gmra.mxu0 %vm321_vm3, %v936_v48 }
  0xc1   : > { %2328 = vmatprep.mubr.msk.bf16.mxu0 %vm2613_vm1, %v2612_v1 }
  0xc2   : > { %2291 = vmatmul.mubr.msk.bf16.gmra.mxu1 %vm321_vm3, %v2876_v33  ;;  %v1111_v33 = vrot.slane %v2708_v4, 2  ;;  %v1114_v4 = vrot.slane %v2770_v36, 2 }
  0xc3   : > { %2294 = vmatprep.mubr.msk.bf16.mxu1 %vm2613_vm1, %v2612_v1 }
  0xc4   : > { %v1113_v11 = vsel %vm1110_vm7, %v1111_v33, %v1112_v62  ;;  %v1115_v13 = vsel %vm1110_vm7, %v1112_v62, %v1114_v4  ;;  %v1117_v42 = vsel %vm1110_vm7, %v1114_v4, %v1116_v24 }
  0xc8   : > { %2329 = vmatmul.mubr.msk.bf16.gmra.mxu0 %vm321_vm3, %v945_v59 }
  0xc9   : > { %2332 = vmatprep.mubr.msk.bf16.mxu0 %vm2613_vm1, %v2612_v1 }
  0xca   : > { %2295 = vmatmul.mubr.msk.bf16.gmra.mxu1 %vm321_vm3, %v770_v63 }
  0xcb   : > { %2338 = vmatprep.mubr.msk.bf16.mxu1 %vm2613_vm1, %v2612_v1 }
  0xd0   : > { %2333 = vmatmul.mubr.msk.bf16.gmra.mxu0 %vm321_vm3, %v954_v6 }
  0xd1   : > { %2376 = vmatprep.mubr.msk.bf16.mxu0 %vm2613_vm1, %v2612_v1 }
  0xd2   : > { %2339 = vmatmul.mubr.msk.bf16.vlgmr.msra.gmra.mxu1 %vm321_vm3, %v1113_v11  ;;  %v1124_v11 = vrot.slane %v2779_v39, 2 }
  0xd3   : > { %2413 = vmatpush3.bf16.msra.mxu1 %v1507_v12  ;;  %2342 = vmatprep.mubr.msk.bf16.mxu1 %vm2613_vm1, %v2612_v1 }
  0xd8   : > { %2377 = vmatmul.mubr.msk.bf16.vlgmr.msra.gmra.mxu0 %vm321_vm3, %v1115_v13 }
  0xd9   : > { %2451 = vmatpush3.bf16.msra.mxu0 %v1682_v14  ;;  %2380 = vmatprep.mubr.msk.bf16.mxu0 %vm2613_vm1, %v2612_v1  ;;  %v1125_v14 = vsel %vm1110_vm7, %v1122_v58, %v1124_v11 }
  0xda   : > { %2343 = vmatmul.mubr.msk.bf16.gmra.mxu1 %vm321_vm3, %v1115_v13 }
  0xdb   : > { %2346 = vmatprep.mubr.msk.bf16.mxu1 %vm2613_vm1, %v2612_v1 }
  0xe0   : > { %v3115_v51 = vpop.f32.mrf.mxu0  ;;  %2381 = vmatmul.mubr.msk.bf16.gmra.mxu0 %vm321_vm3, %v1117_v42 }
  0xe1   : > { %2384 = vmatprep.mubr.msk.bf16.mxu0 %vm2613_vm1, %v2612_v1 }
  0xe2   : > { %v3121_v21 = vpop.f32.mrf.mxu1  ;;  %2347 = vmatmul.mubr.msk.bf16.gmra.mxu1 %vm321_vm3, %v1117_v42  ;;  %v2150_v25 = vpop.f32.mrf.mxu0 }
  0xe3   : > { %2350 = vmatprep.mubr.msk.bf16.mxu1 %vm2613_vm1, %v2612_v1 }
  0xe4   : > { %v2170_v27 = vpop.f32.mrf.mxu1  ;;  %v3126_v0 = vpop.f32.mrf.mxu0 }
  0xe5   : > { %v1126_v27 = vrot.slane %v2856_v26, 2 }
  0xe6   : > { %v3129_v32 = vpop.f32.mrf.mxu1  ;;  %v2151_v34 = vpop.f32.mrf.mxu0 }
  0xe8   : > { %v2171_v35 = vpop.f32.mrf.mxu1  ;;  %v3131_v23 = vpop.f32.mrf.mxu0  ;;  %2385 = vmatmul.mubr.msk.bf16.gmra.mxu0 %vm321_vm3, %v1119_v29 }
  0xe9   : > { %2388 = vmatprep.mubr.msk.bf16.mxu0 %vm2613_vm1, %v2612_v1 }
  0xea   : > { %v3137_v38 = vpop.f32.mrf.mxu1  ;;  %2351 = vmatmul.mubr.msk.bf16.gmra.mxu1 %vm321_vm3, %v1119_v29  ;;  %v2154_v40 = vpop.f32.mrf.mxu0  ;;  %v191_v29 = vld [vmem:[%s2702_s30 + $0x54] sm:$0xf] }
  0xeb   : > { %2354 = vmatprep.mubr.msk.bf16.mxu1 %vm2613_vm1, %v2612_v1 }
  0xec   : > { %v2174_v3 = vpop.f32.mrf.mxu1  ;;  %v3142_v48 = vpop.f32.mrf.mxu0 }
  0xee   : > { %v3145_v52 = vpop.f32.mrf.mxu1  ;;  %v2155_v55 = vpop.f32.mrf.mxu0 }
  0xef   : > { %v1127_v55 = vsel %vm1110_vm7, %v1124_v11, %v1126_v27 }
  0xf0   : > { %v2175_v56 = vpop.f32.mrf.mxu1  ;;  %v3147_v57 = vpop.f32.mrf.mxu0  ;;  %2389 = vmatmul.mubr.msk.bf16.gmra.mxu0 %vm321_vm3, %v1121_v50 }
  0xf1   : > { %2392 = vmatprep.mubr.msk.bf16.mxu0 %vm2613_vm1, %v2612_v1 }
  0xf2   : > { %v3153_v59 = vpop.f32.mrf.mxu1  ;;  %2355 = vmatmul.mubr.msk.bf16.gmra.mxu1 %vm321_vm3, %v1121_v50  ;;  %v2158_v60 = vpop.f32.mrf.mxu0  ;;  %v3193_v50 = vcombine.low %v3056_v47, %v191_v29 }
  0xf3   : > { %2358 = vmatprep.mubr.msk.bf16.mxu1 %vm2613_vm1, %v2612_v1 }
  0xf4   : > { %v2178_v54 = vpop.f32.mrf.mxu1  ;;  %v3158_v63 = vpop.f32.mrf.mxu0 }
  0xf6   : > { %v3161_v33 = vpop.f32.mrf.mxu1  ;;  %v2159_v62 = vpop.f32.mrf.mxu0 }
  0xf7   : > { %v1291_v62 = vrot.slane %v3193_v50, 2 }
  0xf8   : > { %v2179_v6 = vpop.f32.mrf.mxu1  ;;  %v3163_v28 = vpop.f32.mrf.mxu0  ;;  %2393 = vmatmul.mubr.msk.bf16.gmra.mxu0 %vm321_vm3, %v1123_v2 }
  0xf9   : > { %2396 = vmatprep.mubr.msk.bf16.mxu0 %vm2613_vm1, %v2612_v1 }
  0xfa   : > { %v3169_v12 = vpop.f32.mrf.mxu1  ;;  %2359 = vmatmul.mubr.msk.bf16.gmra.mxu1 %vm321_vm3, %v1123_v2  ;;  %v2162_v4 = vpop.f32.mrf.mxu0 }
  0xfb   : > { %2362 = vmatprep.mubr.msk.bf16.mxu1 %vm2613_vm1, %v2612_v1 }
  0xfc   : > { %v2182_v7 = vpop.f32.mrf.mxu1  ;;  %v3174_v13 = vpop.f32.mrf.mxu0 }
  0xfe   : > { %v3177_v24 = vpop.f32.mrf.mxu1  ;;  %v2163_v42 = vpop.f32.mrf.mxu0 }
  0xff   : > { %v1292_v42 = vsel %vm1110_vm7, %v1126_v27, %v1291_v62 }
 0x100   : > { %v2183_v9 = vpop.f32.mrf.mxu1  ;;  %v3179_v25 = vpop.f32.mrf.mxu0  ;;  %2397 = vmatmul.mubr.msk.bf16.gmra.mxu0 %vm321_vm3, %v1125_v14 }
 0x101   : > { %2400 = vmatprep.mubr.msk.bf16.mxu0 %vm2613_vm1, %v2612_v1  ;;  %v3212_v9 = vld [vmem:[%s2702_s30 + $0x58] ss:$0 sps:$4 sm:$0xff]   ;;  %s2490_s30 = smul.u32 144, %s161_s29 }
 0x102   : > { %v513_v34 = vpop.f32.mrf.mxu1  ;;  %2363 = vmatmul.mubr.msk.bf16.gmra.mxu1 %vm321_vm3, %v1125_v14  ;;  %v2166_v35 = vpop.f32.mrf.mxu0 }
 0x103   : > { %v514_v37 = vadd.f32 %v513_v34, %v3115_v51  ;;  %2366 = vmatprep.mubr.msk.bf16.mxu1 %vm2613_vm1, %v2612_v1  ;;  %s3490_s6 = scalar_lea.vmem [#allocation2], %s2490_s30 }
 0x104   : > { %v2188_v40 = vpop.f32.mrf.mxu1  ;;  %v3190_v3 = vpop.f32.mrf.mxu0  ;;  %s1882_s8 = sshll.u32 %s3490_s6, 4  ;;  %s3543_s8 = int_to_ptr.vmem [resolvable:$true] %s1882_s8 }
 0x105   : > { %s2550_s16 = scalar_lea.vmem %s3543_s8, 2304  ;;  %p2557_p0 = scmp.lt.s32.totalorder %s3543_s8, %s2555_s20 }
 0x106   : > { %v516_v56 = vpop.f32.mrf.mxu1  ;;  %v2167_v58 = vpop.f32.mrf.mxu0  ;;  %p2551_p11 = scmp.ne.s32.totalorder %s3543_s8, %s2550_s16  ;;  %p2558_p1 = scmp.lt.s32.totalorder %s2556_s24, %s2550_s16 }
 0x107   : > { %v517_v60 = vadd.f32 %v516_v56, %v3126_v0  ;;  %v1128_v0 = vrot.slane %v3065_v53, 2  ;;  %v1293_v53 = vrot.slane %v3212_v9, 2 }
 0x108   : > { %v2189_v54 = vpop.f32.mrf.mxu1  ;;  %v670_v2 = vpop.f32.mrf.mxu0  ;;  %2401 = vmatmul.mubr.msk.bf16.gmra.mxu0 %vm321_vm3, %v1127_v55  ;;  %p2552_p12 = pnand %p2551_p11, %p2675_p5  ;;  %p2559_p2 = por %p2558_p1, %p2557_p0 }
 0x109   : > { %v3198_v51 = vadd.f32 %v670_v2, %v514_v37  ;;  %2404 = vmatprep.mubr.msk.bf16.mxu0 %vm2613_vm1, %v2612_v1  ;;  %v1129_v37 = vsel %vm1110_vm7, %v1126_v27, %v1128_v0  ;;  %v1294_v2 = vsel %vm1110_vm7, %v1291_v62, %v1293_v53  ;;  %v1437_v0 = vrot.slane %v2853_v22, 2 }
 0x10a   : > { %v521_v47 = vpop.f32.mrf.mxu1  ;;  %2367 = vmatmul.mubr.msk.bf16.gmra.mxu1 %vm321_vm3, %v1127_v55  ;;  %v2226_v6 = vpop.f32.mrf.mxu0  ;;  %v1636_v62 = vrot.slane %v2770_v36, 3  ;;  %p2553_p13 = pneg %p2552_p12 }
 0x10b   : > { %v522_v11 = vadd.f32 %v521_v47, %v3131_v23  ;;  %2370 = vmatprep.mubr.msk.bf16.mxu1 %vm2613_vm1, %v2612_v1 }
 0x10c   : > { %v2192_v4 = vpop.f32.mrf.mxu1  ;;  %v673_v7 = vpop.f32.mrf.mxu0  ;;  %p2560_p3 = pnand %p2559_p2, %p2553_p13 }
 0x10d   : > { %v3208_v14 = vadd.f32 %v673_v7, %v517_v60  ;;  %v1438_v4 = vrot.slane %v2822_v61, 3 }
 0x10e   : > { %v524_v29 = vpop.f32.mrf.mxu1  ;;  %v2227_v34 = vpop.f32.mrf.mxu0 }
 0x10f   : > { %v525_v35 = vadd.f32 %v524_v29, %v3142_v48  ;;  %v1635_v29 = vrot.slane %v2732_v17, 3 }
 0x110   : > { %v2193_v23 = vpop.f32.mrf.mxu1  ;;  %v678_v40 = vpop.f32.mrf.mxu0  ;;  %2405 = vmatmul.mubr.msk.bf16.gmra.mxu0 %vm321_vm3, %v1292_v42 }
 0x111   : > { %v3217_v55 = vadd.f32 %v678_v40, %v522_v11  ;;  %2408 = vmatprep.mubr.msk.bf16.mxu0 %vm2613_vm1, %v2612_v1  ;;  %v1637_v17 = vsel %vm1634_vm8, %v1635_v29, %v1636_v62 }
 0x112   : > { %v529_v56 = vpop.f32.mrf.mxu1  ;;  %2371 = vmatmul.mubr.msk.bf16.gmra.mxu1 %vm321_vm3, %v1129_v37  ;;  %v2230_v58 = vpop.f32.mrf.mxu0 }
 0x113   : > { %v530_v60 = vadd.f32 %v529_v56, %v3147_v57  ;;  %2414 = vmatprep.mubr.msk.bf16.mxu1 %vm2613_vm1, %v2612_v1  ;;  %v1441_v56 = vrot.slane %v2738_v19, 2 }
 0x114   : > { %v2196_v48 = vpop.f32.mrf.mxu1  ;;  %v681_v27 = vpop.f32.mrf.mxu0 }
 0x115   : > { %v3226_v54 = vadd.f32 %v681_v27, %v525_v35  ;;  %v1638_v27 = vrot.slane %v2803_v49, 3 }
 0x116   : > { %v532_v47 = vpop.f32.mrf.mxu1  ;;  %v2231_v6 = vpop.f32.mrf.mxu0 }
 0x117   : > { %v533_v11 = vadd.f32 %v532_v47, %v3158_v63  ;;  %v1439_v63 = vor.u32 %v1438_v4, %v1437_v0 }
 0x118   : > { %v2197_v7 = vpop.f32.mrf.mxu1  ;;  %v686_v42 = vpop.f32.mrf.mxu0  ;;  %2409 = vmatmul.mubr.msk.bf16.gmra.mxu0 %vm321_vm3, %v1294_v2 }
 0x119   : > { %v3233_v57 = vadd.f32 %v686_v42, %v530_v60  ;;  %2452 = vmatprep.mubr.msk.bf16.mxu0 %vm2613_vm1, %v2612_v1  ;;  %v1445_v42 = vrot.slane %v2758_v30, 2 }
 0x11a   : > { %v537_v34 = vpop.f32.mrf.mxu1  ;;  %2415 = vmatmul.mubr.msk.bf16.vlgmr.msra.gmra.mxu1 %vm321_vm3, %v3009_v41  ;;  %v2234_v22 = vpop.f32.mrf.mxu0  ;;  %v1440_v41 = vsel %vm1429_vm6, %v3001_v16, %v1439_v63 }
 0x11b   : > { %v538_v61 = vadd.f32 %v537_v34, %v3163_v28  ;;  %2418 = vmatprep.mubr.msk.bf16.mxu1 %vm2613_vm1, %v2612_v1  ;;  %v1442_v28 = vrot.slane %v2726_v15, 3 }
 0x11c   : > { %v2200_v35 = vpop.f32.mrf.mxu1  ;;  %v689_v37 = vpop.f32.mrf.mxu0 }
 0x11d   : > { %v3244_v23 = vadd.f32 %v689_v37, %v533_v11  ;;  %v1443_v15 = vor.u32 %v1442_v28, %v1441_v56  ;;  %v1639_v11 = vsel %vm1634_vm8, %v1636_v62, %v1638_v27  ;;  %v1640_v62 = vrot.slane %v2714_v8, 3 }
 0x11e   : > { %v540_v40 = vpop.f32.mrf.mxu1  ;;  %v2235_v36 = vpop.f32.mrf.mxu0 }
 0x11f   : > { %v541_v53 = vadd.f32 %v540_v40, %v3174_v13  ;;  %v1444_v7 = vsel %vm1429_vm6, %v1439_v63, %v1443_v15  ;;  %v1641_v37 = vsel %vm1634_vm8, %v1638_v27, %v1640_v62 }
 0x120   : > { %v2201_v58 = vpop.f32.mrf.mxu1  ;;  %v694_v60 = vpop.f32.mrf.mxu0  ;;  %2453 = vmatmul.mubr.msk.bf16.vlgmr.msra.gmra.mxu0 %vm321_vm3, %v1637_v17 }
 0x121   : > { %v3253_v48 = vadd.f32 %v694_v60, %v538_v61  ;;  %2456 = vmatprep.mubr.msk.bf16.mxu0 %vm2613_vm1, %v2612_v1  ;;  %v1642_v60 = vrot.slane %v2720_v10, 3 }
 0x122   : > { %v545_v2 = vpop.f32.mrf.mxu1  ;;  %2419 = vmatmul.mubr.msk.bf16.gmra.mxu1 %vm321_vm3, %v1440_v41  ;;  %v2238_v13 = vpop.f32.mrf.mxu0  ;;  %v1450_v41 = vrot.slane %v2761_v31, 3 }
 0x123   : > { %v546_v16 = vadd.f32 %v545_v2, %v3179_v25  ;;  %2422 = vmatprep.mubr.msk.bf16.mxu1 %vm2613_vm1, %v2612_v1  ;;  %v1446_v25 = vrot.slane %v2741_v20, 3 }
 0x124   : > { %v2204_v19 = vpop.f32.mrf.mxu1  ;;  %v697_v47 = vpop.f32.mrf.mxu0 }
 0x125   : > { %v3262_v6 = vadd.f32 %v697_v47, %v541_v53  ;;  %v1447_v30 = vor.u32 %v1446_v25, %v1445_v42  ;;  %v1449_v53 = vrot.slane %v2792_v45, 2  ;;  %v1644_v42 = vrot.slane %v2735_v18, 3 }
 0x126   : > { %v548_v0 = vpop.f32.mrf.mxu1  ;;  %v2239_v4 = vpop.f32.mrf.mxu0 }
 0x127   : > { %v549_v49 = vadd.f32 %v548_v0, %v3190_v3  ;;  %v1448_v8 = vsel %vm1429_vm6, %v1443_v15, %v1447_v30  ;;  %v1451_v31 = vor.u32 %v1450_v41, %v1449_v53  ;;  %v1643_v15 = vsel %vm1634_vm8, %v1640_v62, %v1642_v60 }
 0x128   : > { %v2205_v29 = vpop.f32.mrf.mxu1  ;;  %v702_v34 = vpop.f32.mrf.mxu0  ;;  %2457 = vmatmul.mubr.msk.bf16.gmra.mxu0 %vm321_vm3, %v1639_v11  ;;  %v1453_v0 = vrot.slane %v2832_v5, 2  ;;  %v1465_v53 = vshll.u32 %v3193_v50, 16 }
 0x129   : > { %v3270_v22 = vadd.f32 %v702_v34, %v546_v16  ;;  %2460 = vmatprep.mubr.msk.bf16.mxu0 %vm2613_vm1, %v2612_v1  ;;  %v1452_v11 = vsel %vm1429_vm6, %v1447_v30, %v1451_v31 }
 0x12a   : > { %v553_v61 = vpop.f32.mrf.mxu1  ;;  %2423 = vmatmul.mubr.msk.bf16.gmra.mxu1 %vm321_vm3, %v1444_v7  ;;  %v2242_v3 = vpop.f32.mrf.mxu0 }
 0x12b   : > { %2426 = vmatprep.mubr.msk.bf16.mxu1 %vm2613_vm1, %v2612_v1  ;;  %v554_v36 = vadd.f32 %v553_v61, %v3121_v21  ;;  %v1645_v61 = vsel %vm1634_vm8, %v1642_v60, %v1644_v42 }
 0x12c   : > { %v2208_v20 = vpop.f32.mrf.mxu1  ;;  %v705_v63 = vpop.f32.mrf.mxu0 }
 0x12d   : > { %v3278_v35 = vadd.f32 %v705_v63, %v549_v49  ;;  %v1457_v63 = vrot.slane %v938_v43, 2  ;;  %v1462_v43 = vshrl.u32 %v3193_v50, 16 }
 0x12e   : > { %v556_v17 = vpop.f32.mrf.mxu1  ;;  %v2243_v40 = vpop.f32.mrf.mxu0 }
 0x12f   : > { %v557_v2 = vadd.f32 %v556_v17, %v3129_v32  ;;  %v1454_v32 = vrot.slane %v2795_v46, 3 }
 0x130   : > { %v2209_v56 = vpop.f32.mrf.mxu1  ;;  %v710_v28 = vpop.f32.mrf.mxu0  ;;  %2461 = vmatmul.mubr.msk.bf16.gmra.mxu0 %vm321_vm3, %v1641_v37 }
 0x131   : > { %v3286_v58 = vadd.f32 %v710_v28, %v554_v36  ;;  %2464 = vmatprep.mubr.msk.bf16.mxu0 %vm2613_vm1, %v2612_v1  ;;  %v1455_v46 = vor.u32 %v1454_v32, %v1453_v0  ;;  %v1646_v36 = vrot.slane %v2779_v39, 3 }
 0x132   : > { %v561_v27 = vpop.f32.mrf.mxu1  ;;  %2427 = vmatmul.mubr.msk.bf16.gmra.mxu1 %vm321_vm3, %v1448_v8  ;;  %v2246_v21 = vpop.f32.mrf.mxu0 }
 0x133   : > { %2430 = vmatprep.mubr.msk.bf16.mxu1 %vm2613_vm1, %v2612_v1  ;;  %v562_v10 = vadd.f32 %v561_v27, %v3137_v38  ;;  %v1456_v20 = vsel %vm1429_vm6, %v1451_v31, %v1455_v46  ;;  %v1647_v39 = vsel %vm1634_vm8, %v1644_v42, %v1646_v36  ;;  %v1467_v31 = vrot.slane %v1465_v53, 3 }
 0x134   : > { %v2212_v45 = vpop.f32.mrf.mxu1  ;;  %v713_v13 = vpop.f32.mrf.mxu0 }
 0x135   : > { %v3295_v16 = vadd.f32 %v713_v13, %v557_v2  ;;  %v1464_v2 = vrot.slane %v1462_v43, 2 }
 0x136   : > { %v564_v19 = vpop.f32.mrf.mxu1  ;;  %v2247_v47 = vpop.f32.mrf.mxu0 }
 0x137   : > { %v565_v29 = vadd.f32 %v564_v19, %v3145_v52  ;;  %v1458_v52 = vrot.slane %v941_v44, 3  ;;  %v1648_v47 = vrot.slane %v2856_v26, 3  ;;  %v1468_v0 = vor.u32 %v1467_v31, %v1464_v2 }
 0x138   : > { %v2213_v4 = vpop.f32.mrf.mxu1  ;;  %v718_v49 = vpop.f32.mrf.mxu0  ;;  %2465 = vmatmul.mubr.msk.bf16.gmra.mxu0 %vm321_vm3, %v1643_v15 }
 0x139   : > { %v3303_v7 = vadd.f32 %v718_v49, %v562_v10  ;;  %2468 = vmatprep.mubr.msk.bf16.mxu0 %vm2613_vm1, %v2612_v1  ;;  %v1459_v41 = vor.u32 %v1458_v52, %v1457_v63  ;;  %v1471_v4 = vshrl.u32 %v3212_v9, 16  ;;  %v1474_v49 = vshll.u32 %v3212_v9, 16 }
 0x13a   : > { %v569_v25 = vpop.f32.mrf.mxu1  ;;  %2431 = vmatmul.mubr.msk.bf16.gmra.mxu1 %vm321_vm3, %v1452_v11  ;;  %v2250_v38 = vpop.f32.mrf.mxu0  ;;  %v1649_v26 = vsel %vm1634_vm8, %v1646_v36, %v1648_v47 }
 0x13b   : > { %2434 = vmatprep.mubr.msk.bf16.mxu1 %vm2613_vm1, %v2612_v1  ;;  %v570_v18 = vadd.f32 %v569_v25, %v3153_v59  ;;  %v1460_v13 = vsel %vm1429_vm6, %v1455_v46, %v1459_v41 }
 0x13c   : > { %v2216_v5 = vpop.f32.mrf.mxu1  ;;  %v721_v34 = vpop.f32.mrf.mxu0 }
 0x13d   : > { %v3312_v62 = vadd.f32 %v721_v34, %v565_v29  ;;  %v1476_v34 = vrot.slane %v1474_v49, 3 }
 0x13e   : > { %v572_v3 = vpop.f32.mrf.mxu1  ;;  %v2251_v30 = vpop.f32.mrf.mxu0 }
 0x13f   : > { %v573_v44 = vadd.f32 %v572_v3, %v3161_v33 }
 0x140   : > { %v2217_v37 = vpop.f32.mrf.mxu1  ;;  %v726_v17 = vpop.f32.mrf.mxu0  ;;  %2469 = vmatmul.mubr.msk.bf16.gmra.mxu0 %vm321_vm3, %v1645_v61 }
 0x141   : > { %v3322_v40 = vadd.f32 %v726_v17, %v570_v18  ;;  %2472 = vmatprep.mubr.msk.bf16.mxu0 %vm2613_vm1, %v2612_v1  ;;  %v1650_v18 = vrot.slane %v3193_v50, 3 }
 0x142   : > { %v577_v59 = vpop.f32.mrf.mxu1  ;;  %2435 = vmatmul.mubr.msk.bf16.gmra.mxu1 %vm321_vm3, %v1456_v20  ;;  %v2254_v8 = vpop.f32.mrf.mxu0 }
 0x143   : > { %2438 = vmatprep.mubr.msk.bf16.mxu1 %vm2613_vm1, %v2612_v1  ;;  %v578_v45 = vadd.f32 %v577_v59, %v3169_v12  ;;  %v1651_v59 = vsel %vm1634_vm8, %v1648_v47, %v1650_v18 }
 0x144   : > { %v2220_v56 = vpop.f32.mrf.mxu1  ;;  %v729_v28 = vpop.f32.mrf.mxu0 }
 0x145   : > { %v3333_v60 = vadd.f32 %v729_v28, %v573_v44  ;;  %v1652_v56 = vrot.slane %v3212_v9, 3 }
 0x146   : > { %v580_v27 = vpop.f32.mrf.mxu1  ;;  %v2255_v21 = vpop.f32.mrf.mxu0 }
 0x147   : > { %v581_v12 = vadd.f32 %v580_v27, %v3177_v24  ;;  %v1469_v24 = vsel %vm1429_vm6, %v1459_v41, %v1468_v0  ;;  %v1653_v31 = vsel %vm1634_vm8, %v1650_v18, %v1652_v56 }
 0x148   : > { %v2221_v15 = vpop.f32.mrf.mxu1  ;;  %v734_v33 = vpop.f32.mrf.mxu0  ;;  %2473 = vmatmul.mubr.msk.bf16.gmra.mxu0 %vm321_vm3, %v1647_v39 }
 0x149   : > { %v3339_v19 = vadd.f32 %v734_v33, %v578_v45  ;;  %2476 = vmatprep.mubr.msk.bf16.mxu0 %vm2613_vm1, %v2612_v1 }
 0x14a   : > { %v814_v10 = vpop.f32.mrf.mxu1  ;;  %2439 = vmatmul.mubr.msk.bf16.gmra.mxu1 %vm321_vm3, %v1460_v13  ;;  %v2258_v11 = vpop.f32.mrf.mxu0 }
 0x14b   : > { %v885_v32 = vadd.f32 %v814_v10, %v3198_v51  ;;  %2442 = vmatprep.mubr.msk.bf16.mxu1 %vm2613_vm1, %v2612_v1  ;;  %v1473_v51 = vrot.slane %v1471_v4, 2 }
 0x14c   : > { %v2264_v42 = vpop.f32.mrf.mxu1  ;;  %v737_v25 = vpop.f32.mrf.mxu0 }
 0x14d   : > { %v3351_v38 = vadd.f32 %v737_v25, %v581_v12  ;;  %v1477_v52 = vor.u32 %v1476_v34, %v1473_v51 }
 0x14e   : > { %v817_v29 = vpop.f32.mrf.mxu1  ;;  %v2259_v46 = vpop.f32.mrf.mxu0 }
 0x14f   : > { %v886_v5 = vadd.f32 %v817_v29, %v3208_v14  ;;  %v1478_v53 = vsel %vm1429_vm6, %v1468_v0, %v1477_v52 }
 0x150   : > { %v2265_v61 = vpop.f32.mrf.mxu1  ;;  %v1019_v3 = vpop.f32.mrf.mxu0  ;;  %2477 = vmatmul.mubr.msk.bf16.gmra.mxu0 %vm321_vm3, %v1649_v26 }
 0x151   : > { %v3357_v30 = vadd.f32 %v1019_v3, %v885_v32  ;;  %2480 = vmatprep.mubr.msk.bf16.mxu0 %vm2613_vm1, %v2612_v1 }
 0x152   : > { %v822_v20 = vpop.f32.mrf.mxu1  ;;  %2443 = vmatmul.mubr.msk.bf16.gmra.mxu1 %vm321_vm3, %v1469_v24  ;;  %v2302_v63 = vpop.f32.mrf.mxu0 }
 0x153   : > { %v887_v14 = vadd.f32 %v822_v20, %v3217_v55  ;;  %2446 = vmatprep.mubr.msk.bf16.mxu1 %vm2613_vm1, %v2612_v1 }
 0x154   : > { %v2268_v37 = vpop.f32.mrf.mxu1  ;;  %v1022_v17 = vpop.f32.mrf.mxu0 }
 0x155   : > { %v3366_v36 = vadd.f32 %v1022_v17, %v886_v5 }
 0x156   : > { %v825_v8 = vpop.f32.mrf.mxu1  ;;  %v2303_v43 = vpop.f32.mrf.mxu0 }
 0x157   : > { %v888_v50 = vadd.f32 %v825_v8, %v3226_v54 }
 0x158   : > { %v2269_v44 = vpop.f32.mrf.mxu1  ;;  %v1027_v41 = vpop.f32.mrf.mxu0  ;;  %2481 = vmatmul.mubr.msk.bf16.gmra.mxu0 %vm321_vm3, %v1651_v59 }
 0x159   : > { %v3372_v55 = vadd.f32 %v1027_v41, %v887_v14  ;;  %2484 = vmatprep.mubr.msk.bf16.mxu0 %vm2613_vm1, %v2612_v1 }
 0x15a   : > { %v830_v28 = vpop.f32.mrf.mxu1  ;;  %2447 = vmatmul.mubr.msk.bf16.gmra.mxu1 %vm321_vm3, %v1478_v53  ;;  %v2306_v39 = vpop.f32.mrf.mxu0 }
 0x15b   : > { %v889_v27 = vadd.f32 %v830_v28, %v3233_v57 }
 0x15c   : > { %v2272_v54 = vpop.f32.mrf.mxu1  ;;  %v1030_v21 = vpop.f32.mrf.mxu0 }
 0x15d   : > { %v3379_v2 = vadd.f32 %v1030_v21, %v888_v50 }
 0x15e   : > { %v833_v45 = vpop.f32.mrf.mxu1  ;;  %v2307_v13 = vpop.f32.mrf.mxu0 }
 0x15f   : > { %v890_v15 = vadd.f32 %v833_v45, %v3244_v23 }
 0x160   : > { %v2273_v33 = vpop.f32.mrf.mxu1  ;;  %v1035_v1 = vpop.f32.mrf.mxu0  ;;  %2485 = vmatmul.mubr.msk.bf16.gmra.mxu0 %vm321_vm3, %v1653_v31 }
 0x161   : > { %v3384_v9 = vadd.f32 %v1035_v1, %v889_v27 }
 0x162   : > { %v838_v47 = vpop.f32.mrf.mxu1  ;;  %v2310_v10 = vpop.f32.mrf.mxu0 }
 0x163   : > { %v891_v57 = vadd.f32 %v838_v47, %v3253_v48 }
 0x164   : > { %v2276_v11 = vpop.f32.mrf.mxu1  ;;  %v1038_v0 = vpop.f32.mrf.mxu0 }
 0x165   : > { %v3387_v12 = vadd.f32 %v1038_v0, %v890_v15 }
 0x166   : > { %v841_v32 = vpop.f32.mrf.mxu1  ;;  %v2311_v4 = vpop.f32.mrf.mxu0 }
 0x167   : > { %v892_v49 = vadd.f32 %v841_v32, %v3262_v6 }
 0x168   : > { %v2277_v42 = vpop.f32.mrf.mxu1  ;;  %v1043_v23 = vpop.f32.mrf.mxu0 }
 0x169   : > { %v3390_v25 = vadd.f32 %v1043_v23, %v891_v57 }
 0x16a   : > { %v846_v26 = vpop.f32.mrf.mxu1  ;;  %v2314_v29 = vpop.f32.mrf.mxu0 }
 0x16b   : > { %v893_v46 = vadd.f32 %v846_v26, %v3270_v22 }
 0x16c   : > { %v2280_v5 = vpop.f32.mrf.mxu1  ;;  %v1046_v24 = vpop.f32.mrf.mxu0 }
 0x16d   : > { %v3393_v51 = vadd.f32 %v1046_v24, %v892_v49 }
 0x16e   : > { %v849_v48 = vpop.f32.mrf.mxu1  ;;  %v2315_v34 = vpop.f32.mrf.mxu0 }
 0x16f   : > { %v894_v61 = vadd.f32 %v849_v48, %v3278_v35 }
 0x170   : > { %v2281_v3 = vpop.f32.mrf.mxu1  ;;  %v1051_v18 = vpop.f32.mrf.mxu0 }
 0x171   : > { %v3396_v20 = vadd.f32 %v1051_v18, %v893_v46 }
 0x172   : > { %v854_v6 = vpop.f32.mrf.mxu1  ;;  %v2318_v63 = vpop.f32.mrf.mxu0 }
 0x173   : > { %v895_v14 = vadd.f32 %v854_v6, %v3286_v58 }
 0x174   : > { %v2284_v52 = vpop.f32.mrf.mxu1  ;;  %v1054_v37 = vpop.f32.mrf.mxu0 }
 0x175   : > { %v3399_v17 = vadd.f32 %v1054_v37, %v894_v61 }
 0x176   : > { %v857_v22 = vpop.f32.mrf.mxu1  ;;  %v2319_v59 = vpop.f32.mrf.mxu0 }
 0x177   : > { %v896_v8 = vadd.f32 %v857_v22, %v3295_v16 }
 0x178   : > { %v2285_v43 = vpop.f32.mrf.mxu1  ;;  %v1059_v50 = vpop.f32.mrf.mxu0 }
 0x179   : > { %v3402_v53 = vadd.f32 %v1059_v50, %v895_v14 }
 0x17a   : > { %v862_v35 = vpop.f32.mrf.mxu1  ;;  %v2322_v44 = vpop.f32.mrf.mxu0 }
 0x17b   : > { %v897_v41 = vadd.f32 %v862_v35, %v3303_v7 }
 0x17c   : > { %v2288_v56 = vpop.f32.mrf.mxu1  ;;  %v1062_v28 = vpop.f32.mrf.mxu0 }
 0x17d   : > { %v3405_v39 = vadd.f32 %v1062_v28, %v896_v8 }
 0x17e   : > { %v865_v58 = vpop.f32.mrf.mxu1  ;;  %v2323_v27 = vpop.f32.mrf.mxu0 }
 0x17f   : > { %v898_v54 = vadd.f32 %v865_v58, %v3312_v62 }
 0x180   : > { %v2289_v21 = vpop.f32.mrf.mxu1  ;;  %v1067_v31 = vpop.f32.mrf.mxu0 }
 0x181   : > { %v3408_v45 = vadd.f32 %v1067_v31, %v897_v41 }
 0x182   : > { %v870_v16 = vpop.f32.mrf.mxu1  ;;  %v2326_v13 = vpop.f32.mrf.mxu0 }
 0x183   : > { %v899_v15 = vadd.f32 %v870_v16, %v3322_v40 }
 0x184   : > { %v2292_v33 = vpop.f32.mrf.mxu1  ;;  %v1070_v1 = vpop.f32.mrf.mxu0 }
 0x185   : > { %v3411_v47 = vadd.f32 %v1070_v1, %v898_v54 }
 0x186   : > { %v873_v7 = vpop.f32.mrf.mxu1  ;;  %v2327_v10 = vpop.f32.mrf.mxu0 }
 0x187   : > { %v900_v57 = vadd.f32 %v873_v7, %v3333_v60 }
 0x188   : > { %v2293_v11 = vpop.f32.mrf.mxu1  ;;  %v1075_v0 = vpop.f32.mrf.mxu0 }
 0x189   : > { %v3414_v32 = vadd.f32 %v1075_v0, %v899_v15 }
 0x18a   : > { %v878_v62 = vpop.f32.mrf.mxu1  ;;  %v2330_v4 = vpop.f32.mrf.mxu0 }
 0x18b   : > { %v901_v49 = vadd.f32 %v878_v62, %v3339_v19 }
 0x18c   : > { %v2296_v42 = vpop.f32.mrf.mxu1  ;;  %v1078_v23 = vpop.f32.mrf.mxu0 }
 0x18d   : > { %v3417_v26 = vadd.f32 %v1078_v23, %v900_v57 }
 0x18e   : > { %v881_v40 = vpop.f32.mrf.mxu1  ;;  %v2331_v29 = vpop.f32.mrf.mxu0 }
 0x18f   : > { %v902_v46 = vadd.f32 %v881_v40, %v3351_v38 }
 0x190   : > { %v2297_v5 = vpop.f32.mrf.mxu1  ;;  %v1083_v24 = vpop.f32.mrf.mxu0 }
 0x191   : > { %v3420_v48 = vadd.f32 %v1083_v24, %v901_v49 }
 0x192   : > { %v1194_v60 = vpop.f32.mrf.mxu1  ;;  %v2334_v34 = vpop.f32.mrf.mxu0 }
 0x193   : > { %v1265_v61 = vadd.f32 %v1194_v60, %v3357_v30 }
 0x194   : > { %v2340_v3 = vpop.f32.mrf.mxu1  ;;  %v1086_v18 = vpop.f32.mrf.mxu0 }
 0x195   : > { %v3423_v6 = vadd.f32 %v1086_v18, %v902_v46 }
 0x196   : > { %v1197_v19 = vpop.f32.mrf.mxu1  ;;  %v2335_v63 = vpop.f32.mrf.mxu0 }
 0x197   : > { %v1266_v14 = vadd.f32 %v1197_v19, %v3366_v36 }
 0x198   : > { %v2341_v52 = vpop.f32.mrf.mxu1  ;;  %v1338_v37 = vpop.f32.mrf.mxu0 }
 0x199   : > { %v3426_v22 = vadd.f32 %v1338_v37, %v1265_v61 }
 0x19a   : > { %v1202_v38 = vpop.f32.mrf.mxu1  ;;  %v2378_v59 = vpop.f32.mrf.mxu0 }
 0x19b   : > { %v1267_v8 = vadd.f32 %v1202_v38, %v3372_v55 }
 0x19c   : > { %v2344_v43 = vpop.f32.mrf.mxu1  ;;  %v1341_v50 = vpop.f32.mrf.mxu0 }
 0x19d   : > { %v3429_v35 = vadd.f32 %v1341_v50, %v1266_v14 }
 0x19e   : > { %v1205_v30 = vpop.f32.mrf.mxu1  ;;  %v2379_v44 = vpop.f32.mrf.mxu0 }
 0x19f   : > { %v1268_v41 = vadd.f32 %v1205_v30, %v3379_v2 }
 0x1a0   : > { %v2345_v56 = vpop.f32.mrf.mxu1  ;;  %v1346_v28 = vpop.f32.mrf.mxu0 }
 0x1a1   : > { %v3432_v58 = vadd.f32 %v1346_v28, %v1267_v8 }
 0x1a2   : > { %v1210_v36 = vpop.f32.mrf.mxu1  ;;  %v2382_v27 = vpop.f32.mrf.mxu0 }
 0x1a3   : > { %v1269_v54 = vadd.f32 %v1210_v36, %v3384_v9 }
 0x1a4   : > { %v2348_v21 = vpop.f32.mrf.mxu1  ;;  %v1349_v31 = vpop.f32.mrf.mxu0 }
 0x1a5   : > { %v3435_v16 = vadd.f32 %v1349_v31, %v1268_v41 }
 0x1a6   : > { %v1213_v55 = vpop.f32.mrf.mxu1  ;;  %v2383_v13 = vpop.f32.mrf.mxu0 }
 0x1a7   : > { %v1270_v15 = vadd.f32 %v1213_v55, %v3387_v12 }
 0x1a8   : > { %v2349_v33 = vpop.f32.mrf.mxu1  ;;  %v1354_v1 = vpop.f32.mrf.mxu0 }
 0x1a9   : > { %v3438_v7 = vadd.f32 %v1354_v1, %v1269_v54 }
 0x1aa   : > { %v1218_v2 = vpop.f32.mrf.mxu1  ;;  %v2386_v10 = vpop.f32.mrf.mxu0 }
 0x1ab   : > { %v1271_v57 = vadd.f32 %v1218_v2, %v3390_v25 }
 0x1ac   : > { %v2352_v11 = vpop.f32.mrf.mxu1  ;;  %v1357_v0 = vpop.f32.mrf.mxu0 }
 0x1ad   : > { %v3441_v62 = vadd.f32 %v1357_v0, %v1270_v15 }
 0x1ae   : > { %v1221_v9 = vpop.f32.mrf.mxu1  ;;  %v2387_v4 = vpop.f32.mrf.mxu0 }
 0x1af   : > { %v1272_v49 = vadd.f32 %v1221_v9, %v3393_v51 }
 0x1b0   : > { %v2353_v42 = vpop.f32.mrf.mxu1  ;;  %v1362_v23 = vpop.f32.mrf.mxu0 }
 0x1b1   : > { %v3444_v40 = vadd.f32 %v1362_v23, %v1271_v57 }
 0x1b2   : > { %v1226_v12 = vpop.f32.mrf.mxu1  ;;  %v2390_v29 = vpop.f32.mrf.mxu0 }
 0x1b3   : > { %v1273_v46 = vadd.f32 %v1226_v12, %v3396_v20 }
 0x1b4   : > { %v2356_v5 = vpop.f32.mrf.mxu1  ;;  %v1365_v24 = vpop.f32.mrf.mxu0 }
 0x1b5   : > { %v3447_v60 = vadd.f32 %v1365_v24, %v1272_v49 }
 0x1b6   : > { %v1229_v25 = vpop.f32.mrf.mxu1  ;;  %v2391_v34 = vpop.f32.mrf.mxu0 }
 0x1b7   : > { %v1274_v61 = vadd.f32 %v1229_v25, %v3399_v17 }
 0x1b8   : > { %v2357_v3 = vpop.f32.mrf.mxu1  ;;  %v1370_v18 = vpop.f32.mrf.mxu0 }
 0x1b9   : > { %v3450_v19 = vadd.f32 %v1370_v18, %v1273_v46 }
 0x1ba   : > { %v1234_v51 = vpop.f32.mrf.mxu1  ;;  %v2394_v63 = vpop.f32.mrf.mxu0 }
 0x1bb   : > { %v1275_v14 = vadd.f32 %v1234_v51, %v3402_v53 }
 0x1bc   : > { %v2360_v52 = vpop.f32.mrf.mxu1  ;;  %v1373_v37 = vpop.f32.mrf.mxu0 }
 0x1bd   : > { %v3453_v38 = vadd.f32 %v1373_v37, %v1274_v61 }
 0x1be   : > { %v1237_v20 = vpop.f32.mrf.mxu1  ;;  %v2395_v59 = vpop.f32.mrf.mxu0 }
 0x1bf   : > { %v1276_v8 = vadd.f32 %v1237_v20, %v3405_v39 }
 0x1c0   : > { %v2361_v43 = vpop.f32.mrf.mxu1  ;;  %v1378_v50 = vpop.f32.mrf.mxu0 }
 0x1c1   : > { %v3456_v30 = vadd.f32 %v1378_v50, %v1275_v14 }
 0x1c2   : > { %v1242_v17 = vpop.f32.mrf.mxu1  ;;  %v2398_v44 = vpop.f32.mrf.mxu0 }
 0x1c3   : > { %v1277_v41 = vadd.f32 %v1242_v17, %v3408_v45 }
 0x1c4   : > { %v2364_v56 = vpop.f32.mrf.mxu1  ;;  %v1381_v28 = vpop.f32.mrf.mxu0 }
 0x1c5   : > { %v3459_v36 = vadd.f32 %v1381_v28, %v1276_v8 }
 0x1c6   : > { %v1245_v53 = vpop.f32.mrf.mxu1  ;;  %v2399_v27 = vpop.f32.mrf.mxu0 }
 0x1c7   : > { %v1278_v54 = vadd.f32 %v1245_v53, %v3411_v47 }
 0x1c8   : > { %v2365_v21 = vpop.f32.mrf.mxu1  ;;  %v1386_v31 = vpop.f32.mrf.mxu0 }
 0x1c9   : > { %v3462_v55 = vadd.f32 %v1386_v31, %v1277_v41 }
 0x1ca   : > { %v1250_v39 = vpop.f32.mrf.mxu1  ;;  %v2402_v13 = vpop.f32.mrf.mxu0 }
 0x1cb   : > { %v1279_v15 = vadd.f32 %v1250_v39, %v3414_v32 }
 0x1cc   : > { %v2368_v33 = vpop.f32.mrf.mxu1  ;;  %v1389_v1 = vpop.f32.mrf.mxu0 }
 0x1cd   : > { %v3465_v2 = vadd.f32 %v1389_v1, %v1278_v54 }
 0x1ce   : > { %v1253_v45 = vpop.f32.mrf.mxu1  ;;  %v2403_v10 = vpop.f32.mrf.mxu0 }
 0x1cf   : > { %v1280_v57 = vadd.f32 %v1253_v45, %v3417_v26 }
 0x1d0   : > { %v2369_v11 = vpop.f32.mrf.mxu1  ;;  %v1394_v0 = vpop.f32.mrf.mxu0 }
 0x1d1   : > { %v3468_v9 = vadd.f32 %v1394_v0, %v1279_v15 }
 0x1d2   : > { %v1258_v47 = vpop.f32.mrf.mxu1  ;;  %v2406_v4 = vpop.f32.mrf.mxu0 }
 0x1d3   : > { %v1281_v49 = vadd.f32 %v1258_v47, %v3420_v48 }
 0x1d4   : > { %v2372_v42 = vpop.f32.mrf.mxu1  ;;  %v1397_v23 = vpop.f32.mrf.mxu0 }
 0x1d5   : > { %v3471_v32 = vadd.f32 %v1397_v23, %v1280_v57 }
 0x1d6   : > { %v1261_v12 = vpop.f32.mrf.mxu1  ;;  %v2407_v29 = vpop.f32.mrf.mxu0 }
 0x1d7   : > { %v1282_v46 = vadd.f32 %v1261_v12, %v3423_v6  ;;  %v3485_v6 = vld [vmem:[%s3595_s2] ss:$0 sm:$0xff] }
 0x1d8   : > { %v2373_v5 = vpop.f32.mrf.mxu1  ;;  %v1402_v26 = vpop.f32.mrf.mxu0 }
 0x1d9   : > { %v3474_v24 = vadd.f32 %v1402_v26, %v1281_v49 }
 0x1da   : > { %v1543_v25 = vpop.f32.mrf.mxu1  ;;  %v2410_v34 = vpop.f32.mrf.mxu0 }
 0x1db   : > { %v1614_v63 = vadd.f32 %v1543_v25, %v3426_v22 }
 0x1dc   : > { %v2416_v61 = vpop.f32.mrf.mxu1  ;;  %v1405_v3 = vpop.f32.mrf.mxu0 }
 0x1dd   : > { %v3476_v18 = vadd.f32 %v1405_v3, %v1282_v46 }
 0x1de   : > { %v1546_v48 = vpop.f32.mrf.mxu1  ;;  %v2411_v51 = vpop.f32.mrf.mxu0 }
 0x1df   : > { %v1615_v8 = vadd.f32 %v1546_v48, %v3429_v35 }
 0x1e0   : > { %v2417_v14 = vpop.f32.mrf.mxu1  ;;  %v1718_v52 = vpop.f32.mrf.mxu0 }
 0x1e1   : > { %v1789_v37 = vadd.f32 %v1718_v52, %v1614_v63 }
 0x1e2   : > { %v1551_v20 = vpop.f32.mrf.mxu1  ;;  %v2454_v59 = vpop.f32.mrf.mxu0 }
 0x1e3   : > { %v1814_v43 = vadd.f32 %v3485_v6, %v1789_v37  ;;  %v1616_v28 = vadd.f32 %v1551_v20, %v3432_v58 }
 0x1e4   : > { %v2420_v50 = vpop.f32.mrf.mxu1  ;;  %v1721_v17 = vpop.f32.mrf.mxu0 }
 0x1e5   : > { %v1832_v44 = vmax.f32 %v1814_v43, 0.0  ;;  %v1790_v22 = vadd.f32 %v1721_v17, %v1615_v8 }
 0x1e6   : > { %v1554_v41 = vpop.f32.mrf.mxu1  ;;  %v2455_v56 = vpop.f32.mrf.mxu0 }
 0x1e7   : > { %1850 = vst [vmem:[%s3490_s6] sm:$0xff] %v1832_v44  ;;  %v1815_v53 = vadd.f32 %v3485_v6, %v1790_v22  ;;  %v1617_v13 = vadd.f32 %v1554_v41, %v3435_v16 }
 0x1e8   : > { %v2421_v27 = vpop.f32.mrf.mxu1  ;;  %v1726_v35 = vpop.f32.mrf.mxu0 }
 0x1e9   : > { %v1833_v54 = vmax.f32 %v1815_v53, 0.0  ;;  %v1791_v21 = vadd.f32 %v1726_v35, %v1616_v28 }
 0x1ea   : > { %v1559_v31 = vpop.f32.mrf.mxu1  ;;  %v2458_v39 = vpop.f32.mrf.mxu0 }
 0x1eb   : > { %1851 = vst [vmem:[%s3490_s6 + $0x8] sm:$0xff] %v1833_v54  ;;  %v1816_v15 = vadd.f32 %v3485_v6, %v1791_v21  ;;  %v1618_v11 = vadd.f32 %v1559_v31, %v3438_v7 }
 0x1ec   : > { %v2424_v58 = vpop.f32.mrf.mxu1  ;;  %v1729_v33 = vpop.f32.mrf.mxu0 }
 0x1ed   : > { %v1834_v1 = vmax.f32 %v1816_v15, 0.0  ;;  %v1792_v45 = vadd.f32 %v1729_v33, %v1617_v13 }
 0x1ee   : > { %v1562_v10 = vpop.f32.mrf.mxu1  ;;  %v2459_v57 = vpop.f32.mrf.mxu0 }
 0x1ef   : > { %1852 = vst [vmem:[%s3490_s6 + $0x10] sm:$0xff] %v1834_v1  ;;  %v1817_v0 = vadd.f32 %v3485_v6, %v1792_v45  ;;  %v1619_v12 = vadd.f32 %v1562_v10, %v3441_v62 }
 0x1f0   : > { %v2425_v47 = vpop.f32.mrf.mxu1  ;;  %v1734_v4 = vpop.f32.mrf.mxu0 }
 0x1f1   : > { %v1835_v49 = vmax.f32 %v1817_v0, 0.0  ;;  %v1793_v16 = vadd.f32 %v1734_v4, %v1618_v11 }
 0x1f2   : > { %v1567_v42 = vpop.f32.mrf.mxu1  ;;  %v2462_v23 = vpop.f32.mrf.mxu0 }
 0x1f3   : > { %1853 = vst [vmem:[%s3490_s6 + $0x18] sm:$0xff] %v1835_v49  ;;  %v1818_v29 = vadd.f32 %v3485_v6, %v1793_v16  ;;  %v1620_v61 = vadd.f32 %v1567_v42, %v3444_v40 }
 0x1f4   : > { %v2428_v46 = vpop.f32.mrf.mxu1  ;;  %v1737_v5 = vpop.f32.mrf.mxu0 }
 0x1f5   : > { %v1836_v26 = vmax.f32 %v1818_v29, 0.0  ;;  %v1794_v7 = vadd.f32 %v1737_v5, %v1619_v12 }
 0x1f6   : > { %v1570_v25 = vpop.f32.mrf.mxu1  ;;  %v2463_v34 = vpop.f32.mrf.mxu0 }
 0x1f7   : > { %1854 = vst [vmem:[%s3490_s6 + $0x20] sm:$0xff] %v1836_v26  ;;  %v1819_v3 = vadd.f32 %v3485_v6, %v1794_v7  ;;  %v1621_v37 = vadd.f32 %v1570_v25, %v3447_v60 }
 0x1f8   : > { %v2429_v48 = vpop.f32.mrf.mxu1  ;;  %v1742_v51 = vpop.f32.mrf.mxu0 }
 0x1f9   : > { %v1837_v63 = vmax.f32 %v1819_v3, 0.0  ;;  %v1795_v62 = vadd.f32 %v1742_v51, %v1620_v61 }
 0x1fa   : > { %v1575_v14 = vpop.f32.mrf.mxu1  ;;  %v2466_v52 = vpop.f32.mrf.mxu0 }
 0x1fb   : > { %1855 = vst [vmem:[%s3490_s6 + $0x28] sm:$0xff] %v1837_v63  ;;  %v1820_v20 = vadd.f32 %v3485_v6, %v1795_v62  ;;  %v1622_v44 = vadd.f32 %v1575_v14, %v3450_v19 }
 0x1fc   : > { %v2432_v59 = vpop.f32.mrf.mxu1  ;;  %v1745_v8 = vpop.f32.mrf.mxu0 }
 0x1fd   : > { %v1838_v43 = vmax.f32 %v1820_v20, 0.0  ;;  %v1796_v40 = vadd.f32 %v1745_v8, %v1621_v37 }
 0x1fe   : > { %v1578_v50 = vpop.f32.mrf.mxu1  ;;  %v2467_v17 = vpop.f32.mrf.mxu0 }
 0x1ff   : > { %1856 = vst [vmem:[%s3490_s6 + $0x30] sm:$0xff] %v1838_v43  ;;  %v1821_v22 = vadd.f32 %v3485_v6, %v1796_v40  ;;  %v1623_v35 = vadd.f32 %v1578_v50, %v3453_v38 }
 0x200   : > { %v2433_v41 = vpop.f32.mrf.mxu1  ;;  %v1750_v56 = vpop.f32.mrf.mxu0 }
 0x201   : > { %v1839_v28 = vmax.f32 %v1821_v22, 0.0  ;;  %v1797_v60 = vadd.f32 %v1750_v56, %v1622_v44 }
 0x202   : > { %v1583_v53 = vpop.f32.mrf.mxu1  ;;  %v2470_v27 = vpop.f32.mrf.mxu0 }
 0x203   : > { %1857 = vst [vmem:[%s3490_s6 + $0x38] sm:$0xff] %v1839_v28  ;;  %v1822_v54 = vadd.f32 %v3485_v6, %v1797_v60  ;;  %v1624_v58 = vadd.f32 %v1583_v53, %v3456_v30 }
 0x204   : > { %v2436_v21 = vpop.f32.mrf.mxu1  ;;  %v1753_v31 = vpop.f32.mrf.mxu0 }
 0x205   : > { %v1840_v39 = vmax.f32 %v1822_v54, 0.0  ;;  %v1798_v19 = vadd.f32 %v1753_v31, %v1623_v35 }
 0x206   : > { %v1586_v13 = vpop.f32.mrf.mxu1  ;;  %v2471_v15 = vpop.f32.mrf.mxu0 }
 0x207   : > { %1858 = vst [vmem:[%s3490_s6 + $0x40] sm:$0xff] %v1840_v39  ;;  %v1823_v33 = vadd.f32 %v3485_v6, %v1798_v19  ;;  %v1625_v0 = vadd.f32 %v1586_v13, %v3459_v36 }
 0x208   : > { %v2437_v1 = vpop.f32.mrf.mxu1  ;;  %v1758_v45 = vpop.f32.mrf.mxu0 }
 0x209   : > { %v1841_v10 = vmax.f32 %v1823_v33, 0.0  ;;  %v1799_v38 = vadd.f32 %v1758_v45, %v1624_v58 }
 0x20a   : > { %v1591_v57 = vpop.f32.mrf.mxu1  ;;  %v2474_v11 = vpop.f32.mrf.mxu0 }
 0x20b   : > { %1859 = vst [vmem:[%s3490_s6 + $0x48] sm:$0xff] %v1841_v10  ;;  %v1824_v47 = vadd.f32 %v3485_v6, %v1799_v38  ;;  %v1626_v12 = vadd.f32 %v1591_v57, %v3462_v55 }
 0x20c   : > { %v2440_v4 = vpop.f32.mrf.mxu1  ;;  %v1761_v49 = vpop.f32.mrf.mxu0 }
 0x20d   : > { %v1842_v16 = vmax.f32 %v1824_v47, 0.0  ;;  %v1800_v30 = vadd.f32 %v1761_v49, %v1625_v0 }
 0x20e   : > { %v1594_v42 = vpop.f32.mrf.mxu1  ;;  %v2475_v23 = vpop.f32.mrf.mxu0 }
 0x20f   : > { %1860 = vst [vmem:[%s3490_s6 + $0x50] sm:$0xff] %v1842_v16  ;;  %v1825_v29 = vadd.f32 %v3485_v6, %v1800_v30  ;;  %v1627_v34 = vadd.f32 %v1594_v42, %v3465_v2 }
 0x210   : > { %v2441_v46 = vpop.f32.mrf.mxu1  ;;  %v1766_v5 = vpop.f32.mrf.mxu0 }
 0x211   : > { %v1843_v26 = vmax.f32 %v1825_v29, 0.0  ;;  %v1801_v36 = vadd.f32 %v1766_v5, %v1626_v12 }
 0x212   : > { %v1599_v7 = vpop.f32.mrf.mxu1  ;;  %v2478_v25 = vpop.f32.mrf.mxu0 }
 0x213   : > { %1861 = vst [vmem:[%s3490_s6 + $0x58] sm:$0xff] %v1843_v26  ;;  %v1826_v61 = vadd.f32 %v3485_v6, %v1801_v36  ;;  %v1628_v14 = vadd.f32 %v1599_v7, %v3468_v9 }
 0x214   : > { %v2444_v3 = vpop.f32.mrf.mxu1  ;;  %v1769_v48 = vpop.f32.mrf.mxu0 }
 0x215   : > { %v1844_v51 = vmax.f32 %v1826_v61, 0.0  ;;  %v1802_v55 = vadd.f32 %v1769_v48, %v1627_v34 }
 0x216   : > { %v1602_v63 = vpop.f32.mrf.mxu1  ;;  %v2479_v62 = vpop.f32.mrf.mxu0 }
 0x217   : > { %1862 = vst [vmem:[%s3490_s6 + $0x60] sm:$0xff] %v1844_v51  ;;  %v1827_v52 = vadd.f32 %v3485_v6, %v1802_v55  ;;  %v1629_v40 = vadd.f32 %v1602_v63, %v3471_v32 }
 0x218   : > { %v2445_v37 = vpop.f32.mrf.mxu1  ;;  %v1774_v20 = vpop.f32.mrf.mxu0 }
 0x219   : > { %v1845_v59 = vmax.f32 %v1827_v52, 0.0  ;;  %v1803_v2 = vadd.f32 %v1774_v20, %v1628_v14 }
 0x21a   : > { %v1607_v8 = vpop.f32.mrf.mxu1  ;;  %v2482_v43 = vpop.f32.mrf.mxu0 }
 0x21b   : > { %1863 = vst [vmem:[%s3490_s6 + $0x68] sm:$0xff] %v1845_v59  ;;  %v1828_v50 = vadd.f32 %v3485_v6, %v1803_v2  ;;  %v1630_v28 = vadd.f32 %v1607_v8, %v3474_v24 }
 0x21c   : > { %v2448_v17 = vpop.f32.mrf.mxu1  ;;  %v1777_v44 = vpop.f32.mrf.mxu0 }
 0x21d   : > { %v1846_v22 = vmax.f32 %v1828_v50, 0.0  ;;  %v1804_v9 = vadd.f32 %v1777_v44, %v1629_v40 }
 0x21e   : > { %v1610_v41 = vpop.f32.mrf.mxu1  ;;  %v2483_v56 = vpop.f32.mrf.mxu0 }
 0x21f   : > { %1864 = vst [vmem:[%s3490_s6 + $0x70] sm:$0xff] %v1846_v22  ;;  %v1829_v60 = vadd.f32 %v3485_v6, %v1804_v9  ;;  %v1631_v21 = vadd.f32 %v1610_v41, %v3476_v18 }
 0x220   : > { %v2449_v53 = vpop.f32.mrf.mxu1  ;;  %v1782_v32 = vpop.f32.mrf.mxu0 }
 0x221   : > { %v1847_v27 = vmax.f32 %v1829_v60, 0.0  ;;  %v1805_v35 = vadd.f32 %v1782_v32, %v1630_v28 }
 0x222   : > { %v2486_v54 = vpop.f32.mrf.mxu0 }
 0x223   : > { %1865 = vst [vmem:[%s3490_s6 + $0x78] sm:$0xff] %v1847_v27  ;;  %v1830_v31 = vadd.f32 %v3485_v6, %v1805_v35 }
 0x224   : > { %v1785_v39 = vpop.f32.mrf.mxu0 }
 0x225   : > { %v1848_v19 = vmax.f32 %v1830_v31, 0.0  ;;  %v1806_v24 = vadd.f32 %v1785_v39, %v1631_v21 }
 0x226   : > { %v2487_v13 = vpop.f32.mrf.mxu0 }
 0x227   : > { %1866 = vst [vmem:[%s3490_s6 + $0x80] sm:$0xff] %v1848_v19  ;;  %v1831_v15 = vadd.f32 %v3485_v6, %v1806_v24 }
 0x229   : > { %v1849_v58 = vmax.f32 %v1831_v15, 0.0 }
 0x22b   : > { %1867 = vst [vmem:[%s3490_s6 + $0x88] sm:$0xff] %v1849_v58 }
 0x22c   : > { %2563 = shalt.err (!%p2560_p3)
}
 0x22d   : > { %s2564_s25 = scalar_lea.hbm %s3548_s11, 2304  ;;  %s2568_s28 = scalar_lea.hbm %s3596_s3, 9216 }
 0x22e   : > { %p2565_p4 = scmp.ne.s32.totalorder %s3548_s11, %s2564_s25  ;;  %p2569_p9 = scmp.lt.s32.totalorder %s3548_s11, %s3596_s3 }
 0x22f   : > { %p2570_p10 = scmp.lt.s32.totalorder %s2568_s28, %s2564_s25 }
 0x230   : > { %p2566_p7 = pnand %p2565_p4, %p2675_p5 }
 0x231   : > { %p2571_p11 = por %p2570_p10, %p2569_p9 }
 0x232   : > { %p2567_p8 = pneg %p2566_p7 }
 0x234   : > { %p2572_p12 = pnand %p2571_p11, %p2567_p8 }
 0x236   : > { %2575 = shalt.err (!%p2572_p12)
}
 0x237   : > { %s2615_s4 = smov 128   ;;  %s2616_s5 = smov 8  }
 0x238   : > { %2493 = dma.vmem_to_hbm [thread:$0]  (%p2675_p5), %s3543_s8, 2304, %s3548_s11, %s3553_s17, %s2615_s4, %s2615_s4, %s2616_s5  }
 0x239 PF: > { %p2499_p13 = scmp.ge.s32.totalorder %s2610_s15, 2  ;;  %s1897_s6 = sand.u32 1, %s2598_s12  }
 0x23a   : > { %s1898_s7 = scalar_lea.sflag [#allocation3], %s1897_s6 }
 0x23b   : > { %p2496_p0 = pnand %p2499_p13, %p2679_p6 }
 0x23d   : > { %p2497_p1 = pneg %p2496_p0 }
 0x23f   : > { %2593 = dma.done.wait (%p2497_p1), %s1898_s7, 2304  }
 0x240   : > { %2595 = vsyncadd (%p2497_p1), %s1898_s7, 4294964992  ;;  %p13_p2 = scmp.ge.s32.totalorder %s2662_s18, 6   ;;  %s3599_s12 = smov %s2602_s13 }
 0x241   : > { %s3600_s13 = smov %s2606_s14  ;;  %s3601_s14 = smov %s2673_s21 }
 0x242   : > { %s3602_s15 = smov %s2662_s18  ;;  %15 = sbr.rel (!%p13_p2) target bundleno = 3 (0x3), region = 75 }
 0x247   :  { %1903 = vsyncpa [#allocation3], 1 }
 0x248   :  { %1905 = vsyncpa [#allocation3 + $0x1], 1 }

</bundles_post_ra>
